<compile_context>
chip_gen: v6e
topology: v6e:2x2x1
jax: 0.10.0
libtpu: 0.0.40
codegen_flags: <defaults>
</compile_context>

<pallas_src>
import jax
import jax.numpy as jnp
from jax.experimental import pallas as pl
from jax.experimental.pallas import tpu as pltpu

LANE = 128
WIDE_COLS = 128   # internal (MXU-aligned) logit width; real logits live in cols 0..1
OUT_STORE = 8     # stored output width (== full out-array minor dim -> legal block)


# ---------------------------------------------------------------------------
# Kernel
# ---------------------------------------------------------------------------
def make_wide_deep_kernel(hidden_npads, wide_cols, out_store):
    """Kernel for a fixed DNN stack. hidden_npads = padded out width per layer."""
    num_layers = len(hidden_npads)

    def kernel(xin_ref, bias_ref, w_wide_ref, *rest):
        # rest = [w1, ..., wL, w_out, o_ref]
        *w_refs, o_ref = rest
        w_out_ref = w_refs[-1]
        hidden_w_refs = w_refs[:num_layers]

        compute_dtype = xin_ref.dtype

        # ---- deep path first: (Linear -> ReLU)^L on the combined slab ----
        # (the first hidden weight has zero rows over the wide-feature columns)
        h = xin_ref[...]
        off = wide_cols                       # bias layout: [wide | l1 | l2 | ...]
        for li in range(num_layers):
            n = hidden_npads[li]
            b = bias_ref[:, off:off + n]      # (1, n) f32, static lane-aligned slice
            off += n
            z = jnp.dot(h, hidden_w_refs[li][...],
                        preferred_element_type=jnp.float32) + b
            h = jnp.maximum(z, 0.0).astype(compute_dtype)

        # ---- dnn_linear (no bias) ----
        deep = jnp.dot(h, w_out_ref[...], preferred_element_type=jnp.float32)

        # ---- wide path last (short f32 live range); the slab is re-read from
        #      its VMEM block buffer; weight has zero rows over deep columns ----
        wide = jnp.dot(xin_ref[...], w_wide_ref[...],
                       preferred_element_type=jnp.float32)
        wide = jnp.maximum(wide + bias_ref[:, :wide_cols], 0.0)

        # ---- residual add; store only the narrow logit slab (32 B/row) ----
        o_ref[...] = (wide + deep)[:, :out_store].astype(o_ref.dtype)

    return kernel


# ---------------------------------------------------------------------------
# Wrapper helpers
# ---------------------------------------------------------------------------
def _round_up(x, m):
    return (x + m - 1) // m * m


def _cdiv(a, b):
    return -(-a // b)


def _choose_tb(batch, tb_max):
    """Largest 128-multiple batch tile <= tb_max with enough grid steps.

    Prefers >= 4 steps with tb >= 256 (both v7x cores busy + per-core pipelining,
    full 256-wide MXU rows); falls back to >= 2 steps, then to a 128-row tile.
    """
    tb_max = max(LANE, (tb_max // LANE) * LANE)
    for tb in range(tb_max, 2 * LANE - 1, -LANE):
        if _cdiv(batch, tb) >= 4:
            return tb
    for tb in range(tb_max, LANE - 1, -LANE):
        if _cdiv(batch, tb) >= 2:
            return tb
    return LANE


def _physical_vmem_bytes():
    try:
        return int(pltpu.get_tpu_info().vmem_capacity_bytes)
    except Exception:
        return 64 * 1024 * 1024   # conservative default (v7x per-TC VMEM)


# ---------------------------------------------------------------------------
# Wrapper
# ---------------------------------------------------------------------------
def wide_deep_forward(
    x,
    dnn_input,
    w_wide,
    b_wide,
    dnn_ws,
    dnn_bs,
    w_out,
    *,
    tb_max=512,
    compute_dtype=jnp.float32,
    single_buffer_weights=True,
):
    """Runs the Pallas Wide&Deep kernel, tiling over the batch dimension.

    Weights are stored transposed vs. torch nn.Linear, i.e. (in_dim, out_dim);
    biases are (1, out).  Returns (B, 2) float32 logits (pre-softmax).
    """
    assert len(dnn_ws) >= 1 and len(dnn_ws) == len(dnn_bs)
    B, F = x.shape
    _, D0 = dnn_input.shape

    tb = _choose_tb(B, tb_max)
    B_pad = _round_up(B, tb)
    C = F + D0
    C_pad = _round_up(C, LANE)

    # ---- one combined activation slab [X | dnn_input], zero padded ----
    xin = jnp.concatenate(
        [x.astype(jnp.float32), dnn_input.astype(jnp.float32)], axis=1)
    xin = jnp.pad(xin, ((0, B_pad - B), (0, C_pad - C))).astype(compute_dtype)

    # ---- weights: zero-row-extend wide / first-DNN weights so both paths
    #      consume the same slab; pad every dim to multiples of 128 ----
    def pad_w(w, rows, cols, row0=0):
        out = jnp.zeros((rows, cols), jnp.float32)
        out = out.at[row0:row0 + w.shape[0], :w.shape[1]].set(w.astype(jnp.float32))
        return out.astype(compute_dtype)

    w_wide_full = pad_w(w_wide, C_pad, WIDE_COLS, row0=0)

    hidden_npads = []
    hidden_weights = []
    k_prev = C_pad
    for li, w in enumerate(dnn_ws):
        n_pad = _round_up(w.shape[1], LANE)
        row0 = F if li == 0 else 0            # first layer reads the dnn columns
        hidden_weights.append(pad_w(w, k_prev, n_pad, row0=row0))
        hidden_npads.append(n_pad)
        k_prev = n_pad
    w_out_full = pad_w(w_out, k_prev, WIDE_COLS)

    # ---- all biases lane-concatenated into one f32 row: [wide | l1 | l2 ...] ----
    def pad_b(b, n_pad):
        b = jnp.asarray(b, jnp.float32).reshape(1, -1)
        return jnp.pad(b, ((0, 0), (0, n_pad - b.shape[1])))

    bias_cat = jnp.concatenate(
        [pad_b(b_wide, WIDE_COLS)]
        + [pad_b(b, n) for b, n in zip(dnn_bs, hidden_npads)], axis=1)

    inputs = [xin, bias_cat, w_wide_full, *hidden_weights, w_out_full]
    kernel = make_wide_deep_kernel(tuple(hidden_npads), WIDE_COLS, OUT_STORE)

    out_shape = jax.ShapeDtypeStruct((B_pad, OUT_STORE), jnp.float32)
    grid = (B_pad // tb,)

    # ---- advisory cost estimate (helps XLA schedule vs. the gather glue) ----
    flops = 2 * B_pad * (
        C_pad * WIDE_COLS
        + C_pad * hidden_npads[0]
        + sum(a * b for a, b in zip(hidden_npads[:-1], hidden_npads[1:]))
        + k_prev * WIDE_COLS)
    bytes_accessed = sum(int(a.size) * a.dtype.itemsize for a in inputs)
    bytes_accessed += B_pad * OUT_STORE * 4
    cost = pl.CostEstimate(flops=int(flops), transcendentals=0,
                           bytes_accessed=int(bytes_accessed))

    weight_bytes = sum(int(a.size) * a.dtype.itemsize for a in inputs[1:])
    act_bytes = tb * C_pad * jnp.dtype(compute_dtype).itemsize
    out_bytes = tb * OUT_STORE * 4

    def run(weights_buffer_count):
        if weights_buffer_count is None:
            def const_spec(shape):
                return pl.BlockSpec(shape, lambda i: (0, 0))
        else:
            def const_spec(shape):
                # constant block index -> single-buffering halves resident VMEM
                return pl.BlockSpec(shape, lambda i: (0, 0),
                                    pipeline_mode=pl.Buffered(weights_buffer_count))

        in_specs = [pl.BlockSpec((tb, C_pad), lambda i: (i, 0))]
        in_specs += [const_spec(a.shape) for a in inputs[1:]]
        out_specs = pl.BlockSpec((tb, OUT_STORE), lambda i: (i, 0))

        # per-generation VMEM budget: 2x activation/output tiles + weights
        wb = 1 if weights_buffer_count == 1 else 2
        need = 2 * (act_bytes + out_bytes) + wb * weight_bytes + (4 << 20)
        cap = max(32 << 20, _physical_vmem_bytes() * 3 // 4)   # ~48 MiB v7x, ~96 MiB v5e/v6e
        vmem_limit = int(min(max(need, 32 << 20), cap))

        return pl.pallas_call(
            kernel,
            out_shape=out_shape,
            grid=grid,
            in_specs=in_specs,
            out_specs=out_specs,
            compiler_params=pltpu.CompilerParams(
                dimension_semantics=("parallel",),
                vmem_limit_bytes=vmem_limit,
            ),
            cost_estimate=cost,
        )(*inputs)

    if single_buffer_weights:
        try:
            out_padded = jax.block_until_ready(run(1))
        except Exception:
            # pipeline_mode=pl.Buffered(1) not supported by this Pallas build for
            # top-level pallas_call specs -> fall back to default double buffering.
            out_padded = run(None)
    else:
        out_padded = run(None)

    # real logits live in columns 0..1 of the narrow padded slab
    return out_padded[:B, :2]


# ---------------------------------------------------------------------------
# Reference & test harness
# ---------------------------------------------------------------------------
def xavier_normal(key, shape_in_out):
    fan_in, fan_out = shape_in_out
    std = (2.0 / (fan_in + fan_out)) ** 0.5
    return std * jax.random.normal(key, (fan_in, fan_out), dtype=jnp.float32)


def reference_forward(x, dnn_input, w_wide, b_wide, dnn_ws, dnn_bs, w_out):
    wide = jnp.maximum(x @ w_wide + b_wide, 0.0)
    h = dnn_input
    for w, b in zip(dnn_ws, dnn_bs):
        h = jnp.maximum(h @ w + b, 0.0)
    return wide + h @ w_out


if __name__ == "__main__":
    key = jax.random.PRNGKey(0)

    # ---- small synthetic config (Criteo-like but tiny) ----
    B = 256                        # batch -> tb=128, grid of 2 tiles
    EMB = 8                        # embedding_size
    n_sparse, n_dense = 4, 3       # sparse / dense feature counts
    vocab = 10                     # feat_size[sparse_feat]
    dnn_hidden_units = (32, 16)
    F = n_sparse + n_dense         # len(feat_size)
    D0 = n_sparse * EMB + n_dense  # DNN input dim

    keys = jax.random.split(key, 20)

    # ---- input X: first n_sparse columns are integer ids (as float), rest dense ----
    sparse_idx = jax.random.randint(keys[0], (B, n_sparse), 0, vocab)
    dense_vals = jax.random.normal(keys[1], (B, n_dense), dtype=jnp.float32)
    X = jnp.concatenate([sparse_idx.astype(jnp.float32), dense_vals], axis=1)

    # ---- embedding tables (nn.Embedding per sparse feature) + lookup glue ----
    emb_tables = [
        0.1 * jax.random.normal(keys[2 + j], (vocab, EMB), dtype=jnp.float32)
        for j in range(n_sparse)
    ]
    sparse_emb = jnp.concatenate(
        [emb_tables[j][sparse_idx[:, j]] for j in range(n_sparse)], axis=1
    )  # (B, n_sparse * EMB)
    dnn_input = jnp.concatenate([sparse_emb, dense_vals], axis=1)  # (B, D0)

    # ---- parameters (xavier-normal weights, small non-zero biases) ----
    w_wide = xavier_normal(keys[8], (F, 2))
    b_wide = 0.05 * jax.random.normal(keys[9], (1, 2), dtype=jnp.float32)

    dims = [D0] + list(dnn_hidden_units)
    dnn_ws = [xavier_normal(keys[10 + i], (dims[i], dims[i + 1]))
              for i in range(len(dims) - 1)]
    dnn_bs = [0.05 * jax.random.normal(keys[14 + i], (1, dims[i + 1]), dtype=jnp.float32)
              for i in range(len(dims) - 1)]

    w_out = xavier_normal(keys[18], (dnn_hidden_units[-1], 2))

    ref = reference_forward(X, dnn_input, w_wide, b_wide, dnn_ws, dnn_bs, w_out)

    # ---- exact f32 path (default compute dtype) ----
    out_f32 = wide_deep_forward(X, dnn_input, w_wide, b_wide, dnn_ws, dnn_bs, w_out)
    out_f32 = jax.block_until_ready(out_f32)
    assert out_f32.shape == (B, 2)
    assert jnp.allclose(out_f32, ref, atol=1e-5, rtol=1e-5), (out_f32, ref)

    # ---- bf16 opt-in fast path (exact enough here: IDs <= 256, small features) ----
    out_bf16 = wide_deep_forward(X, dnn_input, w_wide, b_wide, dnn_ws, dnn_bs, w_out,
                                 compute_dtype=jnp.bfloat16)
    out_bf16 = jax.block_until_ready(out_bf16)
    assert out_bf16.shape == (B, 2)
    assert jnp.allclose(out_bf16, ref, atol=5e-2, rtol=3e-2), (out_bf16, ref)

    print("KERNEL_OK")
</pallas_src>

<mosaic_0001>
module attributes {stable_mosaic.version = 11 : i64} {
  func.func @kernel(%arg0: i32, %arg1: memref<128x128xf32, #tpu.memory_space<vmem>>, %arg2: memref<1x384xf32, #tpu.memory_space<vmem>>, %arg3: memref<128x128xf32, #tpu.memory_space<vmem>>, %arg4: memref<128x128xf32, #tpu.memory_space<vmem>>, %arg5: memref<128x128xf32, #tpu.memory_space<vmem>>, %arg6: memref<128x128xf32, #tpu.memory_space<vmem>>, %arg7: memref<128x8xf32, #tpu.memory_space<vmem>>) attributes {dimension_semantics = [#tpu.dimension_semantics<parallel>], iteration_bounds = array<i64: 2>, scalar_prefetch = 0 : i64, scratch_operands = 0 : i64, tpu.core_type = #tpu.core_type<tc>, window_params = [{transform_indices = @transform_0, window_bounds = array<i64: 128, 128>}, {pipeline_mode = #tpu.pipeline_mode<synchronous>, transform_indices = @transform_1, window_bounds = array<i64: 1, 384>}, {pipeline_mode = #tpu.pipeline_mode<synchronous>, transform_indices = @transform_2, window_bounds = array<i64: 128, 128>}, {pipeline_mode = #tpu.pipeline_mode<synchronous>, transform_indices = @transform_3, window_bounds = array<i64: 128, 128>}, {pipeline_mode = #tpu.pipeline_mode<synchronous>, transform_indices = @transform_4, window_bounds = array<i64: 128, 128>}, {pipeline_mode = #tpu.pipeline_mode<synchronous>, transform_indices = @transform_5, window_bounds = array<i64: 128, 128>}, {transform_indices = @transform_6, window_bounds = array<i64: 128, 8>}]} {
    %c0 = arith.constant 0 : index
    %c0_0 = arith.constant 0 : index
    %0 = vector.load %arg1[%c0, %c0_0] : memref<128x128xf32, #tpu.memory_space<vmem>>, vector<128x128xf32>
    %c0_1 = arith.constant 0 : index
    %c128 = arith.constant 128 : index
    %1 = vector.load %arg2[%c0_1, %c128] : memref<1x384xf32, #tpu.memory_space<vmem>>, vector<1x128xf32>
    %c0_2 = arith.constant 0 : index
    %c0_3 = arith.constant 0 : index
    %2 = vector.load %arg4[%c0_2, %c0_3] : memref<128x128xf32, #tpu.memory_space<vmem>>, vector<128x128xf32>
    %cst = arith.constant dense<0.000000e+00> : vector<128x128xf32>
    %3 = tpu.matmul %0, %2, %cst {dimension_numbers = #tpu.dot_dimension_numbers<[1], [0], [0], [1], [0, 0, 1, 1], [], []>} : vector<128x128xf32>, vector<128x128xf32>, vector<128x128xf32> -> vector<128x128xf32>
    %4 = vector.broadcast %1 : vector<1x128xf32> to vector<128x128xf32>
    %5 = arith.addf %3, %4 : vector<128x128xf32>
    %cst_4 = arith.constant 0.000000e+00 : f32
    %6 = vector.broadcast %cst_4 : f32 to vector<128x128xf32>
    %7 = arith.maximumf %5, %6 : vector<128x128xf32>
    %c0_5 = arith.constant 0 : index
    %c256 = arith.constant 256 : index
    %8 = vector.load %arg2[%c0_5, %c256] : memref<1x384xf32, #tpu.memory_space<vmem>>, vector<1x128xf32>
    %c0_6 = arith.constant 0 : index
    %c0_7 = arith.constant 0 : index
    %9 = vector.load %arg5[%c0_6, %c0_7] : memref<128x128xf32, #tpu.memory_space<vmem>>, vector<128x128xf32>
    %cst_8 = arith.constant dense<0.000000e+00> : vector<128x128xf32>
    %10 = tpu.matmul %7, %9, %cst_8 {dimension_numbers = #tpu.dot_dimension_numbers<[1], [0], [0], [1], [0, 0, 1, 1], [], []>} : vector<128x128xf32>, vector<128x128xf32>, vector<128x128xf32> -> vector<128x128xf32>
    %11 = vector.broadcast %8 : vector<1x128xf32> to vector<128x128xf32>
    %12 = arith.addf %10, %11 : vector<128x128xf32>
    %cst_9 = arith.constant 0.000000e+00 : f32
    %13 = vector.broadcast %cst_9 : f32 to vector<128x128xf32>
    %14 = arith.maximumf %12, %13 : vector<128x128xf32>
    %c0_10 = arith.constant 0 : index
    %c0_11 = arith.constant 0 : index
    %15 = vector.load %arg6[%c0_10, %c0_11] : memref<128x128xf32, #tpu.memory_space<vmem>>, vector<128x128xf32>
    %cst_12 = arith.constant dense<0.000000e+00> : vector<128x128xf32>
    %16 = tpu.matmul %14, %15, %cst_12 {dimension_numbers = #tpu.dot_dimension_numbers<[1], [0], [0], [1], [0, 0, 1, 1], [], []>} : vector<128x128xf32>, vector<128x128xf32>, vector<128x128xf32> -> vector<128x128xf32>
    %c0_13 = arith.constant 0 : index
    %c0_14 = arith.constant 0 : index
    %17 = vector.load %arg1[%c0_13, %c0_14] : memref<128x128xf32, #tpu.memory_space<vmem>>, vector<128x128xf32>
    %c0_15 = arith.constant 0 : index
    %c0_16 = arith.constant 0 : index
    %18 = vector.load %arg3[%c0_15, %c0_16] : memref<128x128xf32, #tpu.memory_space<vmem>>, vector<128x128xf32>
    %cst_17 = arith.constant dense<0.000000e+00> : vector<128x128xf32>
    %19 = tpu.matmul %17, %18, %cst_17 {dimension_numbers = #tpu.dot_dimension_numbers<[1], [0], [0], [1], [0, 0, 1, 1], [], []>} : vector<128x128xf32>, vector<128x128xf32>, vector<128x128xf32> -> vector<128x128xf32>
    %c0_18 = arith.constant 0 : index
    %c0_19 = arith.constant 0 : index
    %20 = vector.load %arg2[%c0_18, %c0_19] : memref<1x384xf32, #tpu.memory_space<vmem>>, vector<1x128xf32>
    %21 = vector.broadcast %20 : vector<1x128xf32> to vector<128x128xf32>
    %22 = arith.addf %19, %21 : vector<128x128xf32>
    %cst_20 = arith.constant 0.000000e+00 : f32
    %23 = vector.broadcast %cst_20 : f32 to vector<128x128xf32>
    %24 = arith.maximumf %22, %23 : vector<128x128xf32>
    %25 = arith.addf %24, %16 : vector<128x128xf32>
    %26 = vector.extract_strided_slice %25 {offsets = [0, 0], sizes = [128, 8], strides = [1, 1]} : vector<128x128xf32> to vector<128x8xf32>
    %c0_21 = arith.constant 0 : index
    %c0_22 = arith.constant 0 : index
    %27 = vector.load %arg7[%c0_21, %c0_22] : memref<128x8xf32, #tpu.memory_space<vmem>>, vector<128x8xf32>
    tpu.vector_store %arg7[%c0_21, %c0_22], %26 {strides = array<i32>} : memref<128x8xf32, #tpu.memory_space<vmem>>, vector<128x8xf32>,
    return
  }
  func.func @transform_0(%arg0: i32) -> (i32, i32) {
    %c0_i32 = arith.constant 0 : i32
    %c0_i32_0 = arith.constant 0 : i32
    return %arg0, %c0_i32 : i32, i32
  }
  func.func @transform_1(%arg0: i32) -> (i32, i32) {
    %c0_i32 = arith.constant 0 : i32
    %c0_i32_0 = arith.constant 0 : i32
    %c0_i32_1 = arith.constant 0 : i32
    return %c0_i32, %c0_i32_0 : i32, i32
  }
  func.func @transform_2(%arg0: i32) -> (i32, i32) {
    %c0_i32 = arith.constant 0 : i32
    %c0_i32_0 = arith.constant 0 : i32
    %c0_i32_1 = arith.constant 0 : i32
    return %c0_i32, %c0_i32_0 : i32, i32
  }
  func.func @transform_3(%arg0: i32) -> (i32, i32) {
    %c0_i32 = arith.constant 0 : i32
    %c0_i32_0 = arith.constant 0 : i32
    %c0_i32_1 = arith.constant 0 : i32
    return %c0_i32, %c0_i32_0 : i32, i32
  }
  func.func @transform_4(%arg0: i32) -> (i32, i32) {
    %c0_i32 = arith.constant 0 : i32
    %c0_i32_0 = arith.constant 0 : i32
    %c0_i32_1 = arith.constant 0 : i32
    return %c0_i32, %c0_i32_0 : i32, i32
  }
  func.func @transform_5(%arg0: i32) -> (i32, i32) {
    %c0_i32 = arith.constant 0 : i32
    %c0_i32_0 = arith.constant 0 : i32
    %c0_i32_1 = arith.constant 0 : i32
    return %c0_i32, %c0_i32_0 : i32, i32
  }
  func.func @transform_6(%arg0: i32) -> (i32, i32) {
    %c0_i32 = arith.constant 0 : i32
    %c0_i32_0 = arith.constant 0 : i32
    return %arg0, %c0_i32 : i32, i32
  }
}

module attributes {stable_mosaic.version = 11 : i64} {
  func.func @kernel(%arg0: i32, %arg1: memref<128x128xf32, #tpu.memory_space<vmem>>, %arg2: memref<1x384xf32, #tpu.memory_space<vmem>>, %arg3: memref<128x128xf32, #tpu.memory_space<vmem>>, %arg4: memref<128x128xf32, #tpu.memory_space<vmem>>, %arg5: memref<128x128xf32, #tpu.memory_space<vmem>>, %arg6: memref<128x128xf32, #tpu.memory_space<vmem>>, %arg7: memref<128x8xf32, #tpu.memory_space<vmem>>) attributes {dimension_semantics = [#tpu.dimension_semantics<parallel>], iteration_bounds = array<i64: 2>, scalar_prefetch = 0 : i64, scratch_operands = 0 : i64, tpu.core_type = #tpu.core_type<tc>, window_params = [{transform_indices = @transform_0, window_bounds = array<i64: 128, 128>}, {pipeline_mode = #tpu.pipeline_mode<synchronous>, transform_indices = @transform_1, window_bounds = array<i64: 1, 384>}, {pipeline_mode = #tpu.pipeline_mode<synchronous>, transform_indices = @transform_2, window_bounds = array<i64: 128, 128>}, {pipeline_mode = #tpu.pipeline_mode<synchronous>, transform_indices = @transform_3, window_bounds = array<i64: 128, 128>}, {pipeline_mode = #tpu.pipeline_mode<synchronous>, transform_indices = @transform_4, window_bounds = array<i64: 128, 128>}, {pipeline_mode = #tpu.pipeline_mode<synchronous>, transform_indices = @transform_5, window_bounds = array<i64: 128, 128>}, {transform_indices = @transform_6, window_bounds = array<i64: 128, 8>}]} {
    %c0 = arith.constant 0 : index
    %c0_0 = arith.constant 0 : index
    %0 = vector.load %arg1[%c0, %c0_0] : memref<128x128xf32, #tpu.memory_space<vmem>>, vector<128x128xf32>
    %c0_1 = arith.constant 0 : index
    %c128 = arith.constant 128 : index
    %1 = vector.load %arg2[%c0_1, %c128] : memref<1x384xf32, #tpu.memory_space<vmem>>, vector<1x128xf32>
    %c0_2 = arith.constant 0 : index
    %c0_3 = arith.constant 0 : index
    %2 = vector.load %arg4[%c0_2, %c0_3] : memref<128x128xf32, #tpu.memory_space<vmem>>, vector<128x128xf32>
    %cst = arith.constant dense<0.000000e+00> : vector<128x128xf32>
    %3 = tpu.matmul %0, %2, %cst {dimension_numbers = #tpu.dot_dimension_numbers<[1], [0], [0], [1], [0, 0, 1, 1], [], []>} : vector<128x128xf32>, vector<128x128xf32>, vector<128x128xf32> -> vector<128x128xf32>
    %4 = vector.broadcast %1 : vector<1x128xf32> to vector<128x128xf32>
    %5 = arith.addf %3, %4 : vector<128x128xf32>
    %cst_4 = arith.constant 0.000000e+00 : f32
    %6 = vector.broadcast %cst_4 : f32 to vector<128x128xf32>
    %7 = arith.maximumf %5, %6 : vector<128x128xf32>
    %c0_5 = arith.constant 0 : index
    %c256 = arith.constant 256 : index
    %8 = vector.load %arg2[%c0_5, %c256] : memref<1x384xf32, #tpu.memory_space<vmem>>, vector<1x128xf32>
    %c0_6 = arith.constant 0 : index
    %c0_7 = arith.constant 0 : index
    %9 = vector.load %arg5[%c0_6, %c0_7] : memref<128x128xf32, #tpu.memory_space<vmem>>, vector<128x128xf32>
    %cst_8 = arith.constant dense<0.000000e+00> : vector<128x128xf32>
    %10 = tpu.matmul %7, %9, %cst_8 {dimension_numbers = #tpu.dot_dimension_numbers<[1], [0], [0], [1], [0, 0, 1, 1], [], []>} : vector<128x128xf32>, vector<128x128xf32>, vector<128x128xf32> -> vector<128x128xf32>
    %11 = vector.broadcast %8 : vector<1x128xf32> to vector<128x128xf32>
    %12 = arith.addf %10, %11 : vector<128x128xf32>
    %cst_9 = arith.constant 0.000000e+00 : f32
    %13 = vector.broadcast %cst_9 : f32 to vector<128x128xf32>
    %14 = arith.maximumf %12, %13 : vector<128x128xf32>
    %c0_10 = arith.constant 0 : index
    %c0_11 = arith.constant 0 : index
    %15 = vector.load %arg6[%c0_10, %c0_11] : memref<128x128xf32, #tpu.memory_space<vmem>>, vector<128x128xf32>
    %cst_12 = arith.constant dense<0.000000e+00> : vector<128x128xf32>
    %16 = tpu.matmul %14, %15, %cst_12 {dimension_numbers = #tpu.dot_dimension_numbers<[1], [0], [0], [1], [0, 0, 1, 1], [], []>} : vector<128x128xf32>, vector<128x128xf32>, vector<128x128xf32> -> vector<128x128xf32>
    %c0_13 = arith.constant 0 : index
    %c0_14 = arith.constant 0 : index
    %17 = vector.load %arg1[%c0_13, %c0_14] : memref<128x128xf32, #tpu.memory_space<vmem>>, vector<128x128xf32>
    %c0_15 = arith.constant 0 : index
    %c0_16 = arith.constant 0 : index
    %18 = vector.load %arg3[%c0_15, %c0_16] : memref<128x128xf32, #tpu.memory_space<vmem>>, vector<128x128xf32>
    %cst_17 = arith.constant dense<0.000000e+00> : vector<128x128xf32>
    %19 = tpu.matmul %17, %18, %cst_17 {dimension_numbers = #tpu.dot_dimension_numbers<[1], [0], [0], [1], [0, 0, 1, 1], [], []>} : vector<128x128xf32>, vector<128x128xf32>, vector<128x128xf32> -> vector<128x128xf32>
    %c0_18 = arith.constant 0 : index
    %c0_19 = arith.constant 0 : index
    %20 = vector.load %arg2[%c0_18, %c0_19] : memref<1x384xf32, #tpu.memory_space<vmem>>, vector<1x128xf32>
    %21 = vector.broadcast %20 : vector<1x128xf32> to vector<128x128xf32>
    %22 = arith.addf %19, %21 : vector<128x128xf32>
    %cst_20 = arith.constant 0.000000e+00 : f32
    %23 = vector.broadcast %cst_20 : f32 to vector<128x128xf32>
    %24 = arith.maximumf %22, %23 : vector<128x128xf32>
    %25 = arith.addf %24, %16 : vector<128x128xf32>
    %26 = vector.extract_strided_slice %25 {offsets = [0, 0], sizes = [128, 8], strides = [1, 1]} : vector<128x128xf32> to vector<128x8xf32>
    %c0_21 = arith.constant 0 : index
    %c0_22 = arith.constant 0 : index
    %27 = vector.load %arg7[%c0_21, %c0_22] : memref<128x8xf32, #tpu.memory_space<vmem>>, vector<128x8xf32>
    tpu.vector_store %arg7[%c0_21, %c0_22], %26 {strides = array<i32>} : memref<128x8xf32, #tpu.memory_space<vmem>>, vector<128x8xf32>,
    return
  }
  func.func @transform_0(%arg0: i32) -> (i32, i32) {
    %c0_i32 = arith.constant 0 : i32
    %c0_i32_0 = arith.constant 0 : i32
    return %arg0, %c0_i32 : i32, i32
  }
  func.func @transform_1(%arg0: i32) -> (i32, i32) {
    %c0_i32 = arith.constant 0 : i32
    %c0_i32_0 = arith.constant 0 : i32
    %c0_i32_1 = arith.constant 0 : i32
    return %c0_i32, %c0_i32_0 : i32, i32
  }
  func.func @transform_2(%arg0: i32) -> (i32, i32) {
    %c0_i32 = arith.constant 0 : i32
    %c0_i32_0 = arith.constant 0 : i32
    %c0_i32_1 = arith.constant 0 : i32
    return %c0_i32, %c0_i32_0 : i32, i32
  }
  func.func @transform_3(%arg0: i32) -> (i32, i32) {
    %c0_i32 = arith.constant 0 : i32
    %c0_i32_0 = arith.constant 0 : i32
    %c0_i32_1 = arith.constant 0 : i32
    return %c0_i32, %c0_i32_0 : i32, i32
  }
  func.func @transform_4(%arg0: i32) -> (i32, i32) {
    %c0_i32 = arith.constant 0 : i32
    %c0_i32_0 = arith.constant 0 : i32
    %c0_i32_1 = arith.constant 0 : i32
    return %c0_i32, %c0_i32_0 : i32, i32
  }
  func.func @transform_5(%arg0: i32) -> (i32, i32) {
    %c0_i32 = arith.constant 0 : i32
    %c0_i32_0 = arith.constant 0 : i32
    %c0_i32_1 = arith.constant 0 : i32
    return %c0_i32, %c0_i32_0 : i32, i32
  }
  func.func @transform_6(%arg0: i32) -> (i32, i32) {
    %c0_i32 = arith.constant 0 : i32
    %c0_i32_0 = arith.constant 0 : i32
    return %arg0, %c0_i32 : i32, i32
  }
}

</mosaic_0001>

<bundles_post_ra>
// kernel: tpu_custom_call.1
= control target key start
LH: loop header
LB: loop body
LE: loop exit
PB: predicated region body
PF: predicated region fallthrough
CT: control target
= control target key end

     0   :  { %11 = vsyncpa [#allocation3], 0  ;;  %s2297_s0 = inlined_call_operand.hbm [shape: f32[256,128], index: 0, kind: input, shape index: {}]   ;;  %s2298_s1 = inlined_call_operand.hbm [shape: f32[1,384], index: 1, kind: input, shape index: {}]   ;;  %s2299_s2 = inlined_call_operand.hbm [shape: f32[128,128], index: 2, kind: input, shape index: {}]   ;;  %s2300_s3 = inlined_call_operand.hbm [shape: f32[128,128], index: 3, kind: input, shape index: {}]   ;;  %s2301_s4 = inlined_call_operand.hbm [shape: f32[128,128], index: 4, kind: input, shape index: {}]   ;;  %s2302_s5 = inlined_call_operand.hbm [shape: f32[128,128], index: 5, kind: input, shape index: {}]   ;;  %s2303_s6 = inlined_call_operand.vmem [shape: f32[256,8], index: 6, kind: output, shape index: {}]  }
   0x1   :  { %13 = vsyncpa [#allocation3 + $0x1], 0 }
   0x2   :  { %14 = vsyncpa [#allocation5], 0 }
   0x3   :  { %15 = vsyncpa [#allocation8], 0 }
   0x4   :  { %16 = vsyncpa [#allocation11], 0  ;;  %s1942_s21 = smov 0   ;;  %s1944_s22 = smov 0  }
   0x5   :  { %s1946_s23 = smov 0   ;;  %s1948_s24 = smov 0  }
   0x6 LB: > { %s1899_s25 = smov [#allocation4]   ;;  %s1222_s27 = sadd.s32 4294967295, %s1897_s24   ;;  %s1897_s24 = sphi %s1948_s24, %s2320_s24   ;;  %s1893_s23 = sphi %s1946_s23, %s2319_s23   ;;  %s1889_s22 = sphi %s1944_s22, %s2318_s22   ;;  %s1885_s21 = sphi %s1942_s21, %s2317_s21  }
   0x7   : > { %s197_s26 = sshll.u32 %s1899_s25, 4  ;;  %p1224_p0 = scmp.ge.s32.totalorder %s1897_s24, 1  ;;  %s198_s26 = int_to_ptr.vmem [resolvable:$true] %s197_s26 }
   0x8   : > { %p1966_p1 = scmp.eq.s32.totalorder %s1222_s27, 0  ;;  %p184_p2 = scmp.lt.s32.totalorder %s1897_s24, 3 }
   0x9   : > { %s1900_s30 = smov [#allocation7]   ;;  %s1901_s9 = smov [#allocation6]  }
   0xa   : > { %s2308_s28 = scalar_select %p1966_p1, 1, 0 }
   0xb   : > { %p1971_p3 = pnand %p1224_p0, %p184_p2  ;;  %s220_s7 = sshll.u32 %s1900_s30, 4  ;;  %s1983_s7 = int_to_ptr.vmem [resolvable:$true] %s220_s7 }
   0xc   : > { %s207_s10 = sshll.u32 %s1901_s9, 4  ;;  %s1704_s12 = scalar_lea.vmem %s198_s26, 48  ;;  %s1985_s10 = int_to_ptr.vmem [resolvable:$true] %s207_s10 }
   0xd   : > { %s2309_s29 = scalar_select %p1971_p3, 1, 0 }
   0xe   : > { %p1623_p4 = pneg %p1971_p3  ;;  %p1705_p7 = scmp.ne.s32.totalorder %s198_s26, %s1704_s12 }
   0xf   : > { %s1711_s13 = scalar_lea.vmem %s198_s26, 64  ;;  %p1712_p10 = scmp.lt.s32.totalorder %s198_s26, %s198_s26 }
  0x10   : > { %p1979_p5 = pnand %p1623_p4, %p1966_p1  ;;  %p1713_p11 = scmp.lt.s32.totalorder %s1711_s13, %s1704_s12 }
  0x12   : > { %p1989_p6 = pneg %p1979_p5  ;;  %p1714_p12 = por %p1713_p11, %p1712_p10 }
  0x14   : > { %p1707_p8 = pnand %p1705_p7, %p1989_p6 }
  0x16   : > { %p1708_p9 = pneg %p1707_p8 }
  0x18   : > { %p1715_p13 = pnand %p1714_p12, %p1708_p9 }
  0x1a   : > { %1718 = shalt.err (!%p1715_p13)
}
  0x1b   : > { %1626 = dma.hbm_to_vmem [thread:$0]  (!%p1979_p5), %s2298_s1, 48, %s198_s26, [#allocation5]  }
  0x1c   : > { %s1730_s16 = scalar_lea.vmem %s1983_s7, 2048  ;;  %p1738_p7 = scmp.lt.s32.totalorder %s1983_s7, %s1983_s7 }
  0x1d   : > { %p1731_p0 = scmp.ne.s32.totalorder %s1983_s7, %s1730_s16  ;;  %p1739_p8 = scmp.lt.s32.totalorder %s1730_s16, %s1730_s16 }
  0x1f   : > { %p1733_p2 = pnand %p1731_p0, %p1989_p6  ;;  %p1740_p9 = por %p1739_p8, %p1738_p7 }
  0x21   : > { %p1734_p4 = pneg %p1733_p2 }
  0x23   : > { %p1741_p10 = pnand %p1740_p9, %p1734_p4 }
  0x25   : > { %1744 = shalt.err (!%p1741_p10)
}
  0x26   : > { %s1902_s17 = smov 128   ;;  %s1903_s18 = smov 8  }
  0x27   : > { %1632 = dma.hbm_to_vmem [thread:$0]  (!%p1979_p5), %s2300_s3, 2048, %s1983_s7, [#allocation8], %s1902_s17, %s1902_s17, %s1903_s18  }
  0x28   : > { %s1756_s25 = scalar_lea.vmem %s1985_s10, 2048  ;;  %p1764_p0 = scmp.lt.s32.totalorder %s1985_s10, %s1985_s10 }
  0x29   : > { %p1757_p11 = scmp.ne.s32.totalorder %s1985_s10, %s1756_s25  ;;  %p1765_p2 = scmp.lt.s32.totalorder %s1756_s25, %s1756_s25 }
  0x2b   : > { %p1759_p12 = pnand %p1757_p11, %p1989_p6  ;;  %p1766_p4 = por %p1765_p2, %p1764_p0 }
  0x2d   : > { %p1760_p13 = pneg %p1759_p12 }
  0x2f   : > { %p1767_p7 = pnand %p1766_p4, %p1760_p13 }
  0x31   : > { %1770 = shalt.err (!%p1767_p7)
}
  0x32   : > { %1629 = dma.hbm_to_vmem [thread:$0]  (!%p1979_p5), %s2299_s2, 2048, %s1985_s10, [#allocation5], %s1902_s17, %s1902_s17, %s1903_s18  }
  0x33   : > { %s1904_s7 = smov [#allocation9]   ;;  %s1905_s12 = smov [#allocation10]  }
  0x34   : > { %s233_s9 = sshll.u32 %s1904_s7, 4  ;;  %s246_s13 = sshll.u32 %s1905_s12, 4  ;;  %s234_s9 = int_to_ptr.vmem [resolvable:$true] %s233_s9  ;;  %s247_s13 = int_to_ptr.vmem [resolvable:$true] %s246_s13 }
  0x35   : > { %s1782_s14 = scalar_lea.vmem %s234_s9, 2048  ;;  %p1790_p11 = scmp.lt.s32.totalorder %s234_s9, %s234_s9 }
  0x36   : > { %p1783_p8 = scmp.ne.s32.totalorder %s234_s9, %s1782_s14  ;;  %p1791_p12 = scmp.lt.s32.totalorder %s1782_s14, %s1782_s14 }
  0x38   : > { %p1785_p9 = pnand %p1783_p8, %p1989_p6  ;;  %p1792_p13 = por %p1791_p12, %p1790_p11 }
  0x3a   : > { %p1786_p10 = pneg %p1785_p9 }
  0x3c   : > { %p1793_p0 = pnand %p1792_p13, %p1786_p10 }
  0x3e   : > { %1796 = shalt.err (!%p1793_p0)
}
  0x3f   : > { %1635 = dma.hbm_to_vmem [thread:$0]  (!%p1979_p5), %s2301_s4, 2048, %s234_s9, [#allocation8], %s1902_s17, %s1902_s17, %s1903_s18  }
  0x40   : > { %s1808_s16 = scalar_lea.vmem %s247_s13, 2048  ;;  %p1816_p8 = scmp.lt.s32.totalorder %s247_s13, %s247_s13 }
  0x41   : > { %p1809_p2 = scmp.ne.s32.totalorder %s247_s13, %s1808_s16  ;;  %p1817_p9 = scmp.lt.s32.totalorder %s1808_s16, %s1808_s16 }
  0x43   : > { %p1811_p4 = pnand %p1809_p2, %p1989_p6  ;;  %p1818_p10 = por %p1817_p9, %p1816_p8 }
  0x45   : > { %p1812_p7 = pneg %p1811_p4 }
  0x47   : > { %p1819_p11 = pnand %p1818_p10, %p1812_p7 }
  0x49   : > { %1822 = shalt.err (!%p1819_p11)
}
  0x4a   : > { %1638 = dma.hbm_to_vmem [thread:$0]  (!%p1979_p5), %s2302_s5, 2048, %s247_s13, [#allocation11], %s1902_s17, %s1902_s17, %s1903_s18  }
  0x4b   : > { %s2051_s8 = sadd.s32 1, %s1897_s24   ;;  %s29_s25 = sadd.s32 1, %s1893_s23 }
  0x4c   : > { %s26_s11 = ssub.s32 %s1897_s24, %s2051_s8  ;;  %p36_p12 = scmp.ne.s32.totalorder %s1893_s23, %s1889_s22 }
  0x4d   : > { %p27_p6 = scmp.eq.s32.totalorder %s26_s11, 0  ;;  %p37_p13 = scmp.eq.s32.totalorder %s1897_s24, 0 }
  0x4e   : > { %p42_p0 = scmp.ne.s32.totalorder %s1889_s22, %s1885_s21  ;;  %p1648_p7 = scmp.lt.s32.totalorder %s1897_s24, 2 }
  0x4f   : > { %s2062_s26 = scalar_select %p27_p6, %s1893_s23, %s29_s25  }
  0x50   : > { %p38_p2 = por %p37_p13, %p36_p12  ;;  %p2066_p4 = por %p1966_p1, %p42_p0 }
  0x51   : > { %s260_s7 = sand.u32 1, %s1893_s23   ;;  %s1248_s12 = sshll.u32 %s1897_s24, 11 }
  0x52   : > { %s2312_s30 = scalar_select %p2066_p4, 1, 0 }
  0x53   : > { %s1231_s9 = sshll.u32 %s260_s7, 7  ;;  %s2076_s10 = scalar_lea.hbm %s2297_s0, %s1248_s12 }
  0x54   : > { %s264_s21 = scalar_lea.vmem [#allocation2], %s1231_s9  ;;  %p2080_p5 = pnand %p1648_p7, %p38_p2 }
  0x55   : > { %s271_s15 = sshll.u32 %s264_s21, 4  ;;  %s2084_s19 = scalar_lea.sflag [#allocation3], %s260_s7  ;;  %s2078_s15 = int_to_ptr.vmem [resolvable:$true] %s271_s15 }
  0x56   : > { %s1823_s20 = scalar_lea.hbm %s2076_s10, 2048  ;;  %p1825_p9 = pneg %p2080_p5 }
  0x57   : > { %p1824_p8 = scmp.ne.s32.totalorder %s2076_s10, %s1823_s20  ;;  %s1828_s9 = scalar_lea.hbm %s2297_s0, 4096 }
  0x58   : > { %p1829_p6 = scmp.lt.s32.totalorder %s2076_s10, %s2297_s0  ;;  %p1830_p12 = scmp.lt.s32.totalorder %s1828_s9, %s1823_s20 }
  0x59   : > { %p1826_p10 = pnand %p1825_p9, %p1824_p8 }
  0x5a   : > { %p1831_p13 = por %p1830_p12, %p1829_p6 }
  0x5b   : > { %p1827_p11 = pneg %p1826_p10 }
  0x5d   : > { %p1832_p0 = pnand %p1831_p13, %p1827_p11 }
  0x5f   : > { %1835 = shalt.err (!%p1832_p0)
}
  0x60   : > { %s1836_s7 = scalar_lea.vmem %s2078_s15, 2048  ;;  %s1906_s14 = smov [#allocation2]  }
  0x61   : > { %p1837_p2 = scmp.ne.s32.totalorder %s2078_s15, %s1836_s7  ;;  %s1841_s21 = sshll.u32 %s1906_s14, 4  ;;  %s1842_s21 = int_to_ptr.vmem [resolvable:$false] %s1841_s21 }
  0x62   : > { %s1843_s11 = scalar_lea.vmem %s1842_s21, 4096  ;;  %p1844_p10 = scmp.lt.s32.totalorder %s2078_s15, %s1842_s21 }
  0x63   : > { %p1839_p7 = pnand %p1837_p2, %p1825_p9  ;;  %p1845_p1 = scmp.lt.s32.totalorder %s1843_s11, %s1836_s7 }
  0x65   : > { %p1840_p8 = pneg %p1839_p7  ;;  %p1846_p4 = por %p1845_p1, %p1844_p10 }
  0x67   : > { %p1847_p3 = pnand %p1846_p4, %p1840_p8 }
  0x69   : > { %1850 = shalt.err (!%p1847_p3)
}
  0x6a   : > { %1642 = dma.hbm_to_vmem [thread:$0]  (!%p2080_p5), %s2076_s10, 2048, %s2078_s15, %s2084_s19, %s1902_s17, %s1902_s17, %s1903_s18  }
  0x6b   : > { %p2314_p9 = scmp.ne.s32.totalorder %s2309_s29, 0 }
  0x6c   : > { %s285_s20 = sand.u32 (!%p2314_p9), 1, %s1889_s22   ;;  %p2315_p1 = scmp.ne.s32.totalorder (!%p2314_p9), %s2312_s30, 0 }
  0x6d   : > { %283 = sbr.rel (%p2314_p9) target bundleno = 781 (0x30d), region = 44  ;;  %s1235_s25 = sshll.u32 (!%p2314_p9), %s285_s20, 7 }
  0x6e   : > { %s286_s9 = scalar_lea.sflag (!%p2314_p9), [#allocation3], %s285_s20  ;;  %s2111_s12 = scalar_lea.vmem (!%p2314_p9), [#allocation2], %s1235_s25 }
  0x72   : > { %1868 = dma.done.wait (%p2315_p1), %s286_s9, 2048  }
  0x73   : > { %1870 = vsyncadd (%p2315_p1), %s286_s9, 4294965248  ;;  %p2316_p3 = scmp.ne.s32.totalorder %s2308_s28, 0 }
  0x75   : > { %1872 = dma.done.wait (%p2316_p3), [#allocation5], 2096  }
  0x76   : > { %1874 = vsyncadd (%p2316_p3), [#allocation5], 4294965200 }
  0x77   : > { %1876 = dma.done.wait (%p2316_p3), [#allocation8], 4096  }
  0x78   : > { %1878 = vsyncadd (%p2316_p3), [#allocation8], 4294963200 }
  0x79   : > { %1880 = dma.done.wait (%p2316_p3), [#allocation11], 2048  }
  0x7a   : > { %1882 = vsyncadd (%p2316_p3), [#allocation11], 4294965248  ;;  %v377_v0 = vld [vmem:[#allocation7 + $0x78] sm:$0xff]  ;;  %v376_v1 = vld [vmem:[#allocation7 + $0x70] sm:$0xff]  ;;  %s1241_s28 = sshll.u32 %s1222_s27, 4  ;;  %vm1090_vm0 = vcmask 64512  }
  0x7b   : > { %1377 = vmatprep.subr.mxu0 %v377_v0  ;;  %v375_v2 = vld [vmem:[#allocation7 + $0x68] sm:$0xff]  ;;  %v374_v3 = vld [vmem:[#allocation7 + $0x60] sm:$0xff]  ;;  %v373_v5 = vld [vmem:[#allocation7 + $0x58] sm:$0xff]  ;;  %p340_p4 = scmp.lt.s32.totalorder %s1241_s28, 31 }
  0x7c   : > { %1378 = vmatpush3.msra.mxu0 %v377_v0  ;;  %v2130_v4 = vld [vmem:[%s2111_s12] sm:$0xff]  ;;  %v372_v6 = vld [vmem:[#allocation7 + $0x50] sm:$0xff]  ;;  %v371_v7 = vld [vmem:[#allocation7 + $0x48] sm:$0xff] }
  0x7d   : > { %1379 = vmatprep.subr.mxu0 %v376_v1  ;;  %1409 = vmatprep.mubr.f32.mxu0 %v2130_v4  ;;  %v561_v8 = vld [vmem:[#allocation9 + $0x78] sm:$0xff]  ;;  %v560_v9 = vld [vmem:[#allocation9 + $0x70] sm:$0xff]  ;;  %v370_v10 = vld [vmem:[#allocation7 + $0x40] sm:$0xff]  ;;  %s2322_s28 = smov (!%p340_p4, %s1241_s28), 31 }
  0x7e   : > { %1380 = vmatpush3.msra.mxu0 %v376_v1  ;;  %1433 = vmatprep.subr.mxu1 %v561_v8  ;;  %v559_v11 = vld [vmem:[#allocation9 + $0x68] sm:$0xff]  ;;  %v369_v12 = vld [vmem:[#allocation7 + $0x38] sm:$0xff]  ;;  %v558_v13 = vld [vmem:[#allocation9 + $0x60] sm:$0xff]  ;;  %s1242_s29 = sshll.u32 %s2322_s28, 3 }
  0x7f   : > { %1381 = vmatprep.subr.mxu0 %v375_v2  ;;  %1434 = vmatpush3.msra.mxu1 %v561_v8  ;;  %v368_v14 = vld [vmem:[#allocation7 + $0x30] sm:$0xff]  ;;  %v557_v15 = vld [vmem:[#allocation9 + $0x58] sm:$0xff]  ;;  %v367_v16 = vld [vmem:[#allocation7 + $0x28] sm:$0xff]  ;;  %s2237_s24 = scalar_lea.vmem %s2303_s6, %s1242_s29 }
  0x80   : > { %1382 = vmatpush3.msra.mxu0 %v375_v2  ;;  %1435 = vmatprep.subr.mxu1 %v560_v9  ;;  %v556_v17 = vld [vmem:[#allocation9 + $0x50] sm:$0xff]  ;;  %v366_v18 = vld [vmem:[#allocation7 + $0x20] sm:$0xff]  ;;  %v555_v19 = vld [vmem:[#allocation9 + $0x48] sm:$0xff] }
  0x81   : > { %1383 = vmatprep.subr.mxu0 %v374_v3  ;;  %1436 = vmatpush3.msra.mxu1 %v560_v9  ;;  %v365_v20 = vld [vmem:[#allocation7 + $0x18] sm:$0xff]  ;;  %v554_v21 = vld [vmem:[#allocation9 + $0x40] sm:$0xff]  ;;  %v364_v22 = vld [vmem:[#allocation7 + $0x10] sm:$0xff] }
  0x82   : > { %1384 = vmatpush3.msra.mxu0 %v374_v3  ;;  %1437 = vmatprep.subr.mxu1 %v559_v11  ;;  %v553_v23 = vld [vmem:[#allocation9 + $0x38] sm:$0xff]  ;;  %v363_v24 = vld [vmem:[#allocation7 + $0x8] sm:$0xff]  ;;  %v552_v25 = vld [vmem:[#allocation9 + $0x30] sm:$0xff] }
  0x83   : > { %1385 = vmatprep.subr.mxu0 %v373_v5  ;;  %1438 = vmatpush3.msra.mxu1 %v559_v11  ;;  %v362_v26 = vld [vmem:[#allocation7] sm:$0xff]  ;;  %v551_v27 = vld [vmem:[#allocation9 + $0x28] sm:$0xff]  ;;  %v2142_v31 = vld [vmem:[%s2111_s12 + $0x18] sm:$0xff] }
  0x84   : > { %1386 = vmatpush3.msra.mxu0 %v373_v5  ;;  %1439 = vmatprep.subr.mxu1 %v558_v13  ;;  %v2134_v28 = vld [vmem:[%s2111_s12 + $0x8] sm:$0xff]  ;;  %v2137_v30 = vld [vmem:[%s2111_s12 + $0x10] sm:$0xff]  ;;  %v2145_v32 = vld [vmem:[%s2111_s12 + $0x20] sm:$0xff] }
  0x85   : > { %1387 = vmatprep.subr.mxu0 %v372_v6  ;;  %1440 = vmatpush3.msra.mxu1 %v558_v13  ;;  %v550_v29 = vld [vmem:[#allocation9 + $0x20] sm:$0xff]  ;;  %v2153_v34 = vld [vmem:[%s2111_s12 + $0x30] sm:$0xff]  ;;  %v2158_v35 = vld [vmem:[%s2111_s12 + $0x38] sm:$0xff] }
  0x86   : > { %1388 = vmatpush3.msra.mxu0 %v372_v6  ;;  %1441 = vmatprep.subr.mxu1 %v557_v15  ;;  %v2150_v33 = vld [vmem:[%s2111_s12 + $0x28] sm:$0xff]  ;;  %v2161_v36 = vld [vmem:[%s2111_s12 + $0x40] sm:$0xff]  ;;  %v2169_v38 = vld [vmem:[%s2111_s12 + $0x50] sm:$0xff] }
  0x87   : > { %1389 = vmatprep.subr.mxu0 %v371_v7  ;;  %1442 = vmatpush3.msra.mxu1 %v557_v15  ;;  %v2166_v37 = vld [vmem:[%s2111_s12 + $0x48] sm:$0xff]  ;;  %v2174_v39 = vld [vmem:[%s2111_s12 + $0x58] sm:$0xff]  ;;  %v2177_v40 = vld [vmem:[%s2111_s12 + $0x60] sm:$0xff] }
  0x88   : > { %1390 = vmatpush3.msra.mxu0 %v371_v7  ;;  %1443 = vmatprep.subr.mxu1 %v556_v17  ;;  %v2182_v41 = vld [vmem:[%s2111_s12 + $0x68] sm:$0xff]  ;;  %v2185_v42 = vld [vmem:[%s2111_s12 + $0x70] sm:$0xff]  ;;  %v2190_v43 = vld [vmem:[%s2111_s12 + $0x78] sm:$0xff] }
  0x89   : > { %1391 = vmatprep.subr.mxu0 %v370_v10  ;;  %1444 = vmatpush3.msra.mxu1 %v556_v17  ;;  %v549_v44 = vld [vmem:[#allocation9 + $0x18] sm:$0xff]  ;;  %v548_v45 = vld [vmem:[#allocation9 + $0x10] sm:$0xff]  ;;  %v547_v46 = vld [vmem:[#allocation9 + $0x8] sm:$0xff] }
  0x8a   : > { %1392 = vmatpush3.msra.mxu0 %v370_v10  ;;  %1445 = vmatprep.subr.mxu1 %v555_v19  ;;  %v546_v47 = vld [vmem:[#allocation9] sm:$0xff]  ;;  %v905_v48 = vld [vmem:[#allocation6 + $0x78] sm:$0xff]  ;;  %v743_v50 = vld [vmem:[#allocation10 + $0x70] sm:$0xff] }
  0x8b   : > { %1393 = vmatprep.subr.mxu0 %v369_v12  ;;  %1446 = vmatpush3.msra.mxu1 %v555_v19  ;;  %v744_v49 = vld [vmem:[#allocation10 + $0x78] sm:$0xff]  ;;  %v742_v51 = vld [vmem:[#allocation10 + $0x68] sm:$0xff]  ;;  %v741_v52 = vld [vmem:[#allocation10 + $0x60] sm:$0xff] }
  0x8c   : > { %1394 = vmatpush3.msra.mxu0 %v369_v12  ;;  %1447 = vmatprep.subr.mxu1 %v554_v21  ;;  %v740_v53 = vld [vmem:[#allocation10 + $0x58] sm:$0xff]  ;;  %v739_v54 = vld [vmem:[#allocation10 + $0x50] sm:$0xff]  ;;  %v738_v55 = vld [vmem:[#allocation10 + $0x48] sm:$0xff] }
  0x8d   : > { %1395 = vmatprep.subr.mxu0 %v368_v14  ;;  %1448 = vmatpush3.msra.mxu1 %v554_v21  ;;  %v737_v56 = vld [vmem:[#allocation10 + $0x40] sm:$0xff]  ;;  %v736_v57 = vld [vmem:[#allocation10 + $0x38] sm:$0xff]  ;;  %v735_v58 = vld [vmem:[#allocation10 + $0x30] sm:$0xff] }
  0x8e   : > { %1396 = vmatpush3.msra.mxu0 %v368_v14  ;;  %1449 = vmatprep.subr.mxu1 %v553_v23  ;;  %v734_v59 = vld [vmem:[#allocation10 + $0x28] sm:$0xff]  ;;  %v733_v60 = vld [vmem:[#allocation10 + $0x20] sm:$0xff]  ;;  %v732_v61 = vld [vmem:[#allocation10 + $0x18] sm:$0xff] }
  0x8f   : > { %1397 = vmatprep.subr.mxu0 %v367_v16  ;;  %1450 = vmatpush3.msra.mxu1 %v553_v23  ;;  %v2193_v62 = vld [vmem:[#allocation4 + $0x1] ss:$0 sm:$0xff]  ;;  %v904_v10 = vld [vmem:[#allocation6 + $0x70] sm:$0xff]  ;;  %v903_v13 = vld [vmem:[#allocation6 + $0x68] sm:$0xff] }
  0x90   : > { %1398 = vmatpush3.msra.mxu0 %v367_v16  ;;  %1451 = vmatprep.subr.mxu1 %v552_v25  ;;  %v901_v21 = vld [vmem:[#allocation6 + $0x58] sm:$0xff] }
  0x91   : > { %1399 = vmatprep.subr.mxu0 %v366_v18  ;;  %1452 = vmatpush3.msra.mxu1 %v552_v25 }
  0x92   : > { %1400 = vmatpush3.msra.mxu0 %v366_v18  ;;  %1453 = vmatprep.subr.mxu1 %v551_v27  ;;  %v902_v18 = vld [vmem:[#allocation6 + $0x60] sm:$0xff] }
  0x93   : > { %1401 = vmatprep.subr.mxu0 %v365_v20  ;;  %1454 = vmatpush3.msra.mxu1 %v551_v27 }
  0x94   : > { %1402 = vmatpush3.msra.mxu0 %v365_v20  ;;  %1455 = vmatprep.subr.mxu1 %v550_v29 }
  0x95   : > { %1403 = vmatprep.subr.mxu0 %v364_v22  ;;  %1456 = vmatpush3.msra.mxu1 %v550_v29 }
  0x96   : > { %1404 = vmatpush3.msra.mxu0 %v364_v22  ;;  %1457 = vmatprep.subr.mxu1 %v549_v44 }
  0x97   : > { %1405 = vmatprep.subr.mxu0 %v363_v24  ;;  %1458 = vmatpush3.msra.mxu1 %v549_v44  ;;  %v899_v44 = vld [vmem:[#allocation6 + $0x48] sm:$0xff] }
  0x98   : > { %1406 = vmatpush3.msra.mxu0 %v363_v24  ;;  %1459 = vmatprep.subr.mxu1 %v548_v45 }
  0x99   : > { %1407 = vmatprep.subr.mxu0 %v362_v26  ;;  %1460 = vmatpush3.msra.mxu1 %v548_v45 }
  0x9a   : > { %1408 = vmatpush3.msra.mxu0 %v362_v26  ;;  %1461 = vmatprep.subr.mxu1 %v547_v46  ;;  %v900_v26 = vld [vmem:[#allocation6 + $0x50] sm:$0xff] }
  0x9b   : > { %1410 = vmatmul.mubr.f32.vlgmr.msra.gmra.mxu0 %v2134_v28  ;;  %1462 = vmatpush3.msra.mxu1 %v547_v46 }
  0x9c   : > { %1412 = vmatprep.mubr.f32.mxu0 %v2137_v30  ;;  %1463 = vmatprep.subr.mxu1 %v546_v47 }
  0x9d   : > { %1464 = vmatpush3.msra.mxu1 %v546_v47  ;;  %1489 = vmatprep.subr.mxu0 %v744_v49 }
  0x9e   : > { %1545 = vmatprep.subr.mxu1 %v905_v48  ;;  %1490 = vmatpush3.msra.mxu0 %v744_v49  ;;  %v898_v49 = vld [vmem:[#allocation6 + $0x40] sm:$0xff] }
  0x9f   : > { %1413 = vmatmul.mubr.f32.gmra.mxu0 %v2142_v31  ;;  %1491 = vmatprep.subr.mxu0 %v743_v50 }
  0xa0   : > { %1415 = vmatprep.mubr.f32.mxu0 %v2145_v32  ;;  %1492 = vmatpush3.msra.mxu0 %v743_v50 }
  0xa1   : > { %1493 = vmatprep.subr.mxu0 %v742_v51 }
  0xa2   : > { %1494 = vmatpush3.msra.mxu0 %v742_v51 }
  0xa3   : > { %1416 = vmatmul.mubr.f32.gmra.mxu0 %v2150_v33  ;;  %1495 = vmatprep.subr.mxu0 %v741_v52 }
  0xa4   : > { %1418 = vmatprep.mubr.f32.mxu0 %v2153_v34  ;;  %1496 = vmatpush3.msra.mxu0 %v741_v52  ;;  %v897_v52 = vld [vmem:[#allocation6 + $0x38] sm:$0xff] }
  0xa5   : > { %1497 = vmatprep.subr.mxu0 %v740_v53 }
  0xa6   : > { %1498 = vmatpush3.msra.mxu0 %v740_v53 }
  0xa7   : > { %1419 = vmatmul.mubr.f32.gmra.mxu0 %v2158_v35  ;;  %1499 = vmatprep.subr.mxu0 %v739_v54 }
  0xa8   : > { %1421 = vmatprep.mubr.f32.mxu0 %v2161_v36  ;;  %1500 = vmatpush3.msra.mxu0 %v739_v54 }
  0xa9   : > { %1501 = vmatprep.subr.mxu0 %v738_v55 }
  0xaa   : > { %1502 = vmatpush3.msra.mxu0 %v738_v55 }
  0xab   : > { %1422 = vmatmul.mubr.f32.gmra.mxu0 %v2166_v37  ;;  %1503 = vmatprep.subr.mxu0 %v737_v56 }
  0xac   : > { %1424 = vmatprep.mubr.f32.mxu0 %v2169_v38  ;;  %1504 = vmatpush3.msra.mxu0 %v737_v56 }
  0xad   : > { %1505 = vmatprep.subr.mxu0 %v736_v57 }
  0xae   : > { %1506 = vmatpush3.msra.mxu0 %v736_v57  ;;  %v896_v57 = vld [vmem:[#allocation6 + $0x30] sm:$0xff] }
  0xaf   : > { %1425 = vmatmul.mubr.f32.gmra.mxu0 %v2174_v39  ;;  %1507 = vmatprep.subr.mxu0 %v735_v58 }
  0xb0   : > { %1427 = vmatprep.mubr.f32.mxu0 %v2177_v40  ;;  %1508 = vmatpush3.msra.mxu0 %v735_v58 }
  0xb1   : > { %1509 = vmatprep.subr.mxu0 %v734_v59 }
  0xb2   : > { %1510 = vmatpush3.msra.mxu0 %v734_v59 }
  0xb3   : > { %1428 = vmatmul.mubr.f32.gmra.mxu0 %v2182_v41  ;;  %1511 = vmatprep.subr.mxu0 %v733_v60 }
  0xb4   : > { %1430 = vmatprep.mubr.f32.mxu0 %v2185_v42  ;;  %1512 = vmatpush3.msra.mxu0 %v733_v60  ;;  %v895_v60 = vld [vmem:[#allocation6 + $0x28] sm:$0xff] }
  0xb5   : > { %1513 = vmatprep.subr.mxu0 %v732_v61 }
  0xb6   : > { %1514 = vmatpush3.msra.mxu0 %v732_v61 }
  0xb7   : > { %1431 = vmatmul.mubr.f32.gmra.mxu0 %v2190_v43 }
 0x15b   : > { %v1411_v63 = vpop.f32.mrf.mxu0 }
 0x15c   : > { %v456_v0 = vadd.f32 %v1411_v63, %v2193_v62 }
 0x15d   : > { %v450_v1 = vpop.f32.mrf.mxu0 }
 0x15e   : > { %v451_v2 = vadd.f32 %v2193_v62, %v450_v1  ;;  %v530_v6 = vmax.f32 %v456_v0, 0.0 }
 0x15f   : > { %v1414_v3 = vpop.f32.mrf.mxu0 }
 0x160   : > { %v529_v5 = vmax.f32 %v451_v2, 0.0  ;;  %v466_v7 = vadd.f32 %v1414_v3, %v2193_v62  ;;  %v894_v2 = vld [vmem:[#allocation6 + $0x20] sm:$0xff] }
 0x161   : > { %v460_v8 = vpop.f32.mrf.mxu0 }
 0x162   : > { %v461_v9 = vadd.f32 %v2193_v62, %v460_v8  ;;  %1465 = vmatprep.mubr.f32.mxu1 %v529_v5  ;;  %v532_v14 = vmax.f32 %v466_v7, 0.0 }
 0x163   : > { %v1417_v11 = vpop.f32.mrf.mxu0  ;;  %1466 = vmatmul.mubr.f32.vlgmr.msra.gmra.mxu1 %v530_v6  ;;  %v893_v6 = vld [vmem:[#allocation6 + $0x18] sm:$0xff] }
 0x164   : > { %v531_v12 = vmax.f32 %v461_v9, 0.0  ;;  %1546 = vmatpush3.msra.mxu1 %v905_v48  ;;  %v476_v15 = vadd.f32 %v1417_v11, %v2193_v62  ;;  %v892_v11 = vld [vmem:[#allocation6 + $0x10] sm:$0xff] }
 0x165   : > { %v470_v16 = vpop.f32.mrf.mxu0  ;;  %1547 = vmatprep.subr.mxu1 %v904_v10 }
 0x166   : > { %v471_v17 = vadd.f32 %v2193_v62, %v470_v16  ;;  %1468 = vmatprep.mubr.f32.mxu1 %v531_v12  ;;  %1548 = vmatpush3.msra.mxu1 %v904_v10  ;;  %v534_v22 = vmax.f32 %v476_v15, 0.0  ;;  %v890_v15 = vld [vmem:[#allocation6] sm:$0xff]  ;;  %v730_v16 = vld [vmem:[#allocation10 + $0x8] sm:$0xff] }
 0x167   : > { %v1420_v19 = vpop.f32.mrf.mxu0  ;;  %1469 = vmatmul.mubr.f32.gmra.mxu1 %v532_v14  ;;  %1549 = vmatprep.subr.mxu1 %v903_v13 }
 0x168   : > { %v533_v20 = vmax.f32 %v471_v17, 0.0  ;;  %1550 = vmatpush3.msra.mxu1 %v903_v13  ;;  %v486_v23 = vadd.f32 %v1420_v19, %v2193_v62  ;;  %v891_v13 = vld [vmem:[#allocation6 + $0x8] sm:$0xff]  ;;  %v729_v17 = vld [vmem:[#allocation10] sm:$0xff] }
 0x169   : > { %v480_v24 = vpop.f32.mrf.mxu0  ;;  %1551 = vmatprep.subr.mxu1 %v902_v18 }
 0x16a   : > { %v481_v25 = vadd.f32 %v2193_v62, %v480_v24  ;;  %1471 = vmatprep.mubr.f32.mxu1 %v533_v20  ;;  %1552 = vmatpush3.msra.mxu1 %v902_v18  ;;  %v536_v45 = vmax.f32 %v486_v23, 0.0 }
 0x16b   : > { %v1423_v27 = vpop.f32.mrf.mxu0  ;;  %1472 = vmatmul.mubr.f32.gmra.mxu1 %v534_v22  ;;  %1553 = vmatprep.subr.mxu1 %v901_v21 }
 0x16c   : > { %v535_v29 = vmax.f32 %v481_v25, 0.0  ;;  %1554 = vmatpush3.msra.mxu1 %v901_v21  ;;  %v496_v46 = vadd.f32 %v1423_v27, %v2193_v62 }
 0x16d   : > { %v490_v47 = vpop.f32.mrf.mxu0  ;;  %1555 = vmatprep.subr.mxu1 %v900_v26 }
 0x16e   : > { %v491_v48 = vadd.f32 %v2193_v62, %v490_v47  ;;  %1474 = vmatprep.mubr.f32.mxu1 %v535_v29  ;;  %1556 = vmatpush3.msra.mxu1 %v900_v26  ;;  %v538_v53 = vmax.f32 %v496_v46, 0.0 }
 0x16f   : > { %v1426_v50 = vpop.f32.mrf.mxu0  ;;  %1475 = vmatmul.mubr.f32.gmra.mxu1 %v536_v45  ;;  %1557 = vmatprep.subr.mxu1 %v899_v44 }
 0x170   : > { %v537_v51 = vmax.f32 %v491_v48, 0.0  ;;  %1558 = vmatpush3.msra.mxu1 %v899_v44  ;;  %v506_v54 = vadd.f32 %v1426_v50, %v2193_v62 }
 0x171   : > { %v500_v55 = vpop.f32.mrf.mxu0  ;;  %1559 = vmatprep.subr.mxu1 %v898_v49 }
 0x172   : > { %v501_v56 = vadd.f32 %v2193_v62, %v500_v55  ;;  %1477 = vmatprep.mubr.f32.mxu1 %v537_v51  ;;  %1560 = vmatpush3.msra.mxu1 %v898_v49  ;;  %v540_v61 = vmax.f32 %v506_v54, 0.0 }
 0x173   : > { %v1429_v58 = vpop.f32.mrf.mxu0  ;;  %1478 = vmatmul.mubr.f32.gmra.mxu1 %v538_v53  ;;  %1561 = vmatprep.subr.mxu1 %v897_v52 }
 0x174   : > { %v539_v59 = vmax.f32 %v501_v56, 0.0  ;;  %1562 = vmatpush3.msra.mxu1 %v897_v52  ;;  %v516_v63 = vadd.f32 %v1429_v58, %v2193_v62 }
 0x175   : > { %v510_v0 = vpop.f32.mrf.mxu0  ;;  %1563 = vmatprep.subr.mxu1 %v896_v57 }
 0x176   : > { %v511_v1 = vadd.f32 %v2193_v62, %v510_v0  ;;  %1480 = vmatprep.mubr.f32.mxu1 %v539_v59  ;;  %1564 = vmatpush3.msra.mxu1 %v896_v57  ;;  %v542_v7 = vmax.f32 %v516_v63, 0.0 }
 0x177   : > { %v1432_v3 = vpop.f32.mrf.mxu0  ;;  %1481 = vmatmul.mubr.f32.gmra.mxu1 %v540_v61  ;;  %1565 = vmatprep.subr.mxu1 %v895_v60 }
 0x178   : > { %v541_v5 = vmax.f32 %v511_v1, 0.0  ;;  %1566 = vmatpush3.msra.mxu1 %v895_v60  ;;  %v526_v8 = vadd.f32 %v1432_v3, %v2193_v62 }
 0x179   : > { %v520_v9 = vpop.f32.mrf.mxu0  ;;  %1567 = vmatprep.subr.mxu1 %v894_v2 }
 0x17a   : > { %v521_v10 = vadd.f32 %v2193_v62, %v520_v9  ;;  %1483 = vmatprep.mubr.f32.mxu1 %v541_v5  ;;  %1568 = vmatpush3.msra.mxu1 %v894_v2  ;;  %v544_v14 = vmax.f32 %v526_v8, 0.0  ;;  %v731_v62 = vld [vmem:[#allocation10 + $0x10] sm:$0xff] }
 0x17b   : > { %1484 = vmatmul.mubr.f32.gmra.mxu1 %v542_v7  ;;  %1569 = vmatprep.subr.mxu1 %v893_v6 }
 0x17c   : > { %v543_v12 = vmax.f32 %v521_v10, 0.0  ;;  %1570 = vmatpush3.msra.mxu1 %v893_v6  ;;  %1515 = vmatprep.subr.mxu0 %v731_v62 }
 0x17d   : > { %1571 = vmatprep.subr.mxu1 %v892_v11  ;;  %1516 = vmatpush3.msra.mxu0 %v731_v62 }
 0x17e   : > { %1486 = vmatprep.mubr.f32.mxu1 %v543_v12  ;;  %1572 = vmatpush3.msra.mxu1 %v892_v11  ;;  %v2229_v11 = vld [vmem:[#allocation4] ss:$0 sm:$0xff] }
 0x17f   : > { %1487 = vmatmul.mubr.f32.gmra.mxu1 %v544_v14  ;;  %1573 = vmatprep.subr.mxu1 %v891_v13 }
 0x180   : > { %1574 = vmatpush3.msra.mxu1 %v891_v13  ;;  %1577 = vmatprep.mubr.f32.mxu1 %v2130_v4  ;;  %v1244_v4 = vld [vmem:[#allocation4 + $0x2] ss:$0 sm:$0xff] }
 0x181   : > { %1575 = vmatprep.subr.mxu1 %v890_v15  ;;  %1517 = vmatprep.subr.mxu0 %v730_v16 }
 0x182   : > { %1576 = vmatpush3.msra.mxu1 %v890_v15  ;;  %1518 = vmatpush3.msra.mxu0 %v730_v16 }
 0x183   : > { %1578 = vmatmul.mubr.f32.vlgmr.msra.gmra.mxu1 %v2134_v28  ;;  %1519 = vmatprep.subr.mxu0 %v729_v17 }
 0x184   : > { %1580 = vmatprep.mubr.f32.mxu1 %v2137_v30  ;;  %1520 = vmatpush3.msra.mxu0 %v729_v17 }
 0x187   : > { %1581 = vmatmul.mubr.f32.gmra.mxu1 %v2142_v31 }
 0x188   : > { %1583 = vmatprep.mubr.f32.mxu1 %v2145_v32 }
 0x18b   : > { %1584 = vmatmul.mubr.f32.gmra.mxu1 %v2150_v33 }
 0x18c   : > { %1586 = vmatprep.mubr.f32.mxu1 %v2153_v34 }
 0x18f   : > { %1587 = vmatmul.mubr.f32.gmra.mxu1 %v2158_v35 }
 0x190   : > { %1589 = vmatprep.mubr.f32.mxu1 %v2161_v36 }
 0x193   : > { %1590 = vmatmul.mubr.f32.gmra.mxu1 %v2166_v37 }
 0x194   : > { %1592 = vmatprep.mubr.f32.mxu1 %v2169_v38 }
 0x197   : > { %1593 = vmatmul.mubr.f32.gmra.mxu1 %v2174_v39 }
 0x198   : > { %1595 = vmatprep.mubr.f32.mxu1 %v2177_v40 }
 0x19b   : > { %1596 = vmatmul.mubr.f32.gmra.mxu1 %v2182_v41 }
 0x19c   : > { %1598 = vmatprep.mubr.f32.mxu1 %v2185_v42 }
 0x19f   : > { %1599 = vmatmul.mubr.f32.gmra.mxu1 %v2190_v43 }
 0x223   : > { %v1467_v28 = vpop.f32.mrf.mxu1 }
 0x224   : > { %v640_v30 = vadd.f32 %v1467_v28, %v1244_v4 }
 0x225   : > { %v634_v31 = vpop.f32.mrf.mxu1 }
 0x226   : > { %v635_v32 = vadd.f32 %v1244_v4, %v634_v31  ;;  %v714_v35 = vmax.f32 %v640_v30, 0.0 }
 0x227   : > { %v1470_v33 = vpop.f32.mrf.mxu1 }
 0x228   : > { %v713_v34 = vmax.f32 %v635_v32, 0.0  ;;  %v650_v36 = vadd.f32 %v1470_v33, %v1244_v4 }
 0x229   : > { %v644_v37 = vpop.f32.mrf.mxu1 }
 0x22a   : > { %v645_v38 = vadd.f32 %v1244_v4, %v644_v37  ;;  %1521 = vmatprep.mubr.f32.mxu0 %v713_v34  ;;  %v716_v41 = vmax.f32 %v650_v36, 0.0 }
 0x22b   : > { %v1473_v39 = vpop.f32.mrf.mxu1  ;;  %1522 = vmatmul.mubr.f32.vlgmr.msra.gmra.mxu0 %v714_v35 }
 0x22c   : > { %v715_v40 = vmax.f32 %v645_v38, 0.0  ;;  %v660_v18 = vadd.f32 %v1473_v39, %v1244_v4 }
 0x22d   : > { %v654_v42 = vpop.f32.mrf.mxu1 }
 0x22e   : > { %v655_v19 = vadd.f32 %v1244_v4, %v654_v42  ;;  %1524 = vmatprep.mubr.f32.mxu0 %v715_v40  ;;  %v718_v21 = vmax.f32 %v660_v18, 0.0 }
 0x22f   : > { %v1476_v43 = vpop.f32.mrf.mxu1  ;;  %1525 = vmatmul.mubr.f32.gmra.mxu0 %v716_v41 }
 0x230   : > { %v717_v20 = vmax.f32 %v655_v19, 0.0  ;;  %v670_v22 = vadd.f32 %v1476_v43, %v1244_v4 }
 0x231   : > { %v664_v23 = vpop.f32.mrf.mxu1 }
 0x232   : > { %v665_v24 = vadd.f32 %v1244_v4, %v664_v23  ;;  %1527 = vmatprep.mubr.f32.mxu0 %v717_v20  ;;  %v720_v27 = vmax.f32 %v670_v22, 0.0 }
 0x233   : > { %v1479_v25 = vpop.f32.mrf.mxu1  ;;  %1528 = vmatmul.mubr.f32.gmra.mxu0 %v718_v21 }
 0x234   : > { %v719_v26 = vmax.f32 %v665_v24, 0.0  ;;  %v680_v29 = vadd.f32 %v1479_v25, %v1244_v4 }
 0x235   : > { %v674_v44 = vpop.f32.mrf.mxu1 }
 0x236   : > { %v675_v45 = vadd.f32 %v1244_v4, %v674_v44  ;;  %1530 = vmatprep.mubr.f32.mxu0 %v719_v26  ;;  %v722_v48 = vmax.f32 %v680_v29, 0.0 }
 0x237   : > { %v1482_v46 = vpop.f32.mrf.mxu1  ;;  %1531 = vmatmul.mubr.f32.gmra.mxu0 %v720_v27 }
 0x238   : > { %v721_v47 = vmax.f32 %v675_v45, 0.0  ;;  %v690_v49 = vadd.f32 %v1482_v46, %v1244_v4 }
 0x239   : > { %v684_v50 = vpop.f32.mrf.mxu1 }
 0x23a   : > { %v685_v51 = vadd.f32 %v1244_v4, %v684_v50  ;;  %1533 = vmatprep.mubr.f32.mxu0 %v721_v47  ;;  %v724_v54 = vmax.f32 %v690_v49, 0.0 }
 0x23b   : > { %v1485_v52 = vpop.f32.mrf.mxu1  ;;  %1534 = vmatmul.mubr.f32.gmra.mxu0 %v722_v48 }
 0x23c   : > { %v723_v53 = vmax.f32 %v685_v51, 0.0  ;;  %v700_v55 = vadd.f32 %v1485_v52, %v1244_v4 }
 0x23d   : > { %v694_v56 = vpop.f32.mrf.mxu1 }
 0x23e   : > { %v695_v57 = vadd.f32 %v1244_v4, %v694_v56  ;;  %1536 = vmatprep.mubr.f32.mxu0 %v723_v53  ;;  %v726_v60 = vmax.f32 %v700_v55, 0.0 }
 0x23f   : > { %v1488_v58 = vpop.f32.mrf.mxu1  ;;  %1537 = vmatmul.mubr.f32.gmra.mxu0 %v724_v54 }
 0x240   : > { %v725_v59 = vmax.f32 %v695_v57, 0.0  ;;  %v710_v61 = vadd.f32 %v1488_v58, %v1244_v4 }
 0x241   : > { %v704_v63 = vpop.f32.mrf.mxu1 }
 0x242   : > { %v705_v0 = vadd.f32 %v1244_v4, %v704_v63  ;;  %1539 = vmatprep.mubr.f32.mxu0 %v725_v59  ;;  %v728_v2 = vmax.f32 %v710_v61, 0.0 }
 0x243   : > { %1540 = vmatmul.mubr.f32.gmra.mxu0 %v726_v60  ;;  %v1579_v3 = vpop.f32.mrf.mxu1 }
 0x244   : > { %v727_v1 = vmax.f32 %v705_v0, 0.0  ;;  %v985_v13 = vadd.f32 %v1579_v3, %v2229_v11 }
 0x245   : > { %v979_v5 = vpop.f32.mrf.mxu1 }
 0x246   : > { %1542 = vmatprep.mubr.f32.mxu0 %v727_v1  ;;  %v1059_v15 = vmax.f32 %v985_v13, 0.0  ;;  %v980_v62 = vadd.f32 %v2229_v11, %v979_v5 }
 0x247   : > { %1543 = vmatmul.mubr.f32.gmra.mxu0 %v728_v2  ;;  %v1582_v6 = vpop.f32.mrf.mxu1 }
 0x248   : > { %v995_v16 = vadd.f32 %v1582_v6, %v2229_v11  ;;  %v1058_v30 = vmax.f32 %v980_v62, 0.0 }
 0x249   : > { %v989_v7 = vpop.f32.mrf.mxu1 }
 0x24a   : > { %v990_v28 = vadd.f32 %v2229_v11, %v989_v7  ;;  %v1061_v31 = vmax.f32 %v995_v16, 0.0 }
 0x24b   : > { %v1585_v8 = vpop.f32.mrf.mxu1 }
 0x24c   : > { %v1005_v33 = vadd.f32 %v1585_v8, %v2229_v11  ;;  %v1060_v37 = vmax.f32 %v990_v28, 0.0 }
 0x24d   : > { %v999_v9 = vpop.f32.mrf.mxu1 }
 0x24e   : > { %v1063_v39 = vmax.f32 %v1005_v33, 0.0  ;;  %v1000_v41 = vadd.f32 %v2229_v11, %v999_v9 }
 0x24f   : > { %v1588_v10 = vpop.f32.mrf.mxu1 }
 0x250   : > { %v1015_v18 = vadd.f32 %v1588_v10, %v2229_v11  ;;  %v1062_v22 = vmax.f32 %v1000_v41, 0.0 }
 0x251   : > { %v1009_v12 = vpop.f32.mrf.mxu1 }
 0x252   : > { %v1010_v21 = vadd.f32 %v2229_v11, %v1009_v12  ;;  %v1065_v23 = vmax.f32 %v1015_v18, 0.0 }
 0x253   : > { %v1591_v14 = vpop.f32.mrf.mxu1 }
 0x254   : > { %v1025_v25 = vadd.f32 %v1591_v14, %v2229_v11  ;;  %v1064_v44 = vmax.f32 %v1010_v21, 0.0 }
 0x255   : > { %v1019_v17 = vpop.f32.mrf.mxu1 }
 0x256   : > { %v1067_v46 = vmax.f32 %v1025_v25, 0.0  ;;  %v1020_v48 = vadd.f32 %v2229_v11, %v1019_v17 }
 0x257   : > { %v1594_v35 = vpop.f32.mrf.mxu1 }
 0x258   : > { %v1035_v49 = vadd.f32 %v1594_v35, %v2229_v11  ;;  %v1066_v55 = vmax.f32 %v1020_v48, 0.0 }
 0x259   : > { %v1029_v19 = vpop.f32.mrf.mxu1 }
 0x25a   : > { %v1030_v54 = vadd.f32 %v2229_v11, %v1029_v19  ;;  %v1069_v56 = vmax.f32 %v1035_v49, 0.0 }
 0x25b   : > { %v1597_v27 = vpop.f32.mrf.mxu1 }
 0x25c   : > { %v1045_v58 = vadd.f32 %v1597_v27, %v2229_v11  ;;  %v1068_v63 = vmax.f32 %v1030_v54, 0.0 }
 0x25d   : > { %v1039_v51 = vpop.f32.mrf.mxu1 }
 0x25e   : > { %v1071_v1 = vmax.f32 %v1045_v58, 0.0  ;;  %v1040_v3 = vadd.f32 %v2229_v11, %v1039_v51 }
 0x25f   : > { %v1600_v60 = vpop.f32.mrf.mxu1 }
 0x260   : > { %v1055_v5 = vadd.f32 %v1600_v60, %v2229_v11  ;;  %v1070_v10 = vmax.f32 %v1040_v3, 0.0 }
 0x261   : > { %v1049_v7 = vpop.f32.mrf.mxu1 }
 0x262   : > { %v1073_v12 = vmax.f32 %v1055_v5, 0.0  ;;  %v1050_v14 = vadd.f32 %v2229_v11, %v1049_v7 }
 0x264   : > { %v1072_v17 = vmax.f32 %v1050_v14, 0.0 }
 0x2eb   : > { %v1523_v4 = vpop.f32.mrf.mxu0 }
 0x2ec   : > { %v1075_v32 = vadd.f32 %v1523_v4, %v1059_v15 }
 0x2ed   : > { %v811_v34 = vpop.f32.mrf.mxu0 }
 0x2ee   : > { %1092 = vst.msk [vmem:[%s2237_s24 + $0x8] sm:$0xff] %vm1090_vm0, %v1075_v32  ;;  %v1074_v36 = vadd.f32 %v1058_v30, %v811_v34 }
 0x2ef   : > { %v1526_v38 = vpop.f32.mrf.mxu0 }
 0x2f0   : > { %1091 = vst.msk [vmem:[%s2237_s24] sm:$0xff] %vm1090_vm0, %v1074_v36  ;;  %v1077_v40 = vadd.f32 %v1526_v38, %v1061_v31 }
 0x2f1   : > { %v821_v42 = vpop.f32.mrf.mxu0 }
 0x2f2   : > { %1094 = vst.msk [vmem:[%s2237_s24 + $0x18] sm:$0xff] %vm1090_vm0, %v1077_v40  ;;  %v1076_v43 = vadd.f32 %v1060_v37, %v821_v42 }
 0x2f3   : > { %v1529_v20 = vpop.f32.mrf.mxu0 }
 0x2f4   : > { %1093 = vst.msk [vmem:[%s2237_s24 + $0x10] sm:$0xff] %vm1090_vm0, %v1076_v43  ;;  %v1079_v24 = vadd.f32 %v1529_v20, %v1063_v39 }
 0x2f5   : > { %v831_v26 = vpop.f32.mrf.mxu0 }
 0x2f6   : > { %1096 = vst.msk [vmem:[%s2237_s24 + $0x28] sm:$0xff] %vm1090_vm0, %v1079_v24  ;;  %v1078_v29 = vadd.f32 %v1062_v22, %v831_v26 }
 0x2f7   : > { %v1532_v45 = vpop.f32.mrf.mxu0 }
 0x2f8   : > { %1095 = vst.msk [vmem:[%s2237_s24 + $0x20] sm:$0xff] %vm1090_vm0, %v1078_v29  ;;  %v1081_v47 = vadd.f32 %v1532_v45, %v1065_v23 }
 0x2f9   : > { %v841_v50 = vpop.f32.mrf.mxu0 }
 0x2fa   : > { %1098 = vst.msk [vmem:[%s2237_s24 + $0x38] sm:$0xff] %vm1090_vm0, %v1081_v47  ;;  %v1080_v52 = vadd.f32 %v1064_v44, %v841_v50 }
 0x2fb   : > { %v1535_v53 = vpop.f32.mrf.mxu0 }
 0x2fc   : > { %1097 = vst.msk [vmem:[%s2237_s24 + $0x30] sm:$0xff] %vm1090_vm0, %v1080_v52  ;;  %v1083_v57 = vadd.f32 %v1535_v53, %v1067_v46 }
 0x2fd   : > { %v851_v59 = vpop.f32.mrf.mxu0 }
 0x2fe   : > { %1100 = vst.msk [vmem:[%s2237_s24 + $0x48] sm:$0xff] %vm1090_vm0, %v1083_v57  ;;  %v1082_v61 = vadd.f32 %v1066_v55, %v851_v59 }
 0x2ff   : > { %v1538_v0 = vpop.f32.mrf.mxu0 }
 0x300   : > { %1099 = vst.msk [vmem:[%s2237_s24 + $0x40] sm:$0xff] %vm1090_vm0, %v1082_v61  ;;  %v1085_v2 = vadd.f32 %v1538_v0, %v1069_v56 }
 0x301   : > { %v861_v6 = vpop.f32.mrf.mxu0 }
 0x302   : > { %1102 = vst.msk [vmem:[%s2237_s24 + $0x58] sm:$0xff] %vm1090_vm0, %v1085_v2  ;;  %v1084_v8 = vadd.f32 %v1068_v63, %v861_v6 }
 0x303   : > { %v1541_v9 = vpop.f32.mrf.mxu0 }
 0x304   : > { %1101 = vst.msk [vmem:[%s2237_s24 + $0x50] sm:$0xff] %vm1090_vm0, %v1084_v8  ;;  %v1087_v13 = vadd.f32 %v1541_v9, %v1071_v1 }
 0x305   : > { %v871_v15 = vpop.f32.mrf.mxu0 }
 0x306   : > { %1104 = vst.msk [vmem:[%s2237_s24 + $0x68] sm:$0xff] %vm1090_vm0, %v1087_v13  ;;  %v1086_v62 = vadd.f32 %v1070_v10, %v871_v15 }
 0x307   : > { %v1544_v16 = vpop.f32.mrf.mxu0 }
 0x308   : > { %1103 = vst.msk [vmem:[%s2237_s24 + $0x60] sm:$0xff] %vm1090_vm0, %v1086_v62  ;;  %v1089_v4 = vadd.f32 %v1544_v16, %v1073_v12 }
 0x309   : > { %v881_v28 = vpop.f32.mrf.mxu0 }
 0x30a   : > { %1106 = vst.msk [vmem:[%s2237_s24 + $0x78] sm:$0xff] %vm1090_vm0, %v1089_v4  ;;  %v1088_v30 = vadd.f32 %v1072_v17, %v881_v28 }
 0x30c   : > { %1105 = vst.msk [vmem:[%s2237_s24 + $0x70] sm:$0xff] %vm1090_vm0, %v1088_v30 }
 0x30d PF: > { %p19_p5 = scmp.ge.s32.totalorder %s2051_s8, 4   ;;  %s2317_s21 = smov %s1889_s22 }
 0x30e   : > { %s2318_s22 = smov %s1893_s23  ;;  %s2319_s23 = smov %s2062_s26 }
 0x30f   : > { %s2320_s24 = smov %s2051_s8  ;;  %21 = sbr.rel (!%p19_p5) target bundleno = 6 (0x6), region = 104 }
 0x314   :  { %1129 = vsyncpa [#allocation3], 1 }
 0x315   :  { %1131 = vsyncpa [#allocation3 + $0x1], 1 }
 0x316   :  { %1132 = vsyncpa [#allocation5], 1 }
 0x317   :  { %1133 = vsyncpa [#allocation8], 1 }
 0x318   :  { %1134 = vsyncpa [#allocation11], 1 }

// kernel: tpu_custom_call.1
= control target key start
LH: loop header
LB: loop body
LE: loop exit
PB: predicated region body
PF: predicated region fallthrough
CT: control target
= control target key end

     0   :  { %11 = vsyncpa [#allocation3], 0  ;;  %s2297_s0 = inlined_call_operand.hbm [shape: f32[256,128], index: 0, kind: input, shape index: {}]   ;;  %s2298_s1 = inlined_call_operand.hbm [shape: f32[1,384], index: 1, kind: input, shape index: {}]   ;;  %s2299_s2 = inlined_call_operand.hbm [shape: f32[128,128], index: 2, kind: input, shape index: {}]   ;;  %s2300_s3 = inlined_call_operand.hbm [shape: f32[128,128], index: 3, kind: input, shape index: {}]   ;;  %s2301_s4 = inlined_call_operand.hbm [shape: f32[128,128], index: 4, kind: input, shape index: {}]   ;;  %s2302_s5 = inlined_call_operand.hbm [shape: f32[128,128], index: 5, kind: input, shape index: {}]   ;;  %s2303_s6 = inlined_call_operand.vmem [shape: f32[256,8], index: 6, kind: output, shape index: {}]  }
   0x1   :  { %13 = vsyncpa [#allocation3 + $0x1], 0 }
   0x2   :  { %14 = vsyncpa [#allocation5], 0 }
   0x3   :  { %15 = vsyncpa [#allocation8], 0 }
   0x4   :  { %16 = vsyncpa [#allocation11], 0  ;;  %s1942_s21 = smov 0   ;;  %s1944_s22 = smov 0  }
   0x5   :  { %s1946_s23 = smov 0   ;;  %s1948_s24 = smov 0  }
   0x6 LB: > { %s1899_s25 = smov [#allocation4]   ;;  %s1222_s27 = sadd.s32 4294967295, %s1897_s24   ;;  %s1897_s24 = sphi %s1948_s24, %s2320_s24   ;;  %s1893_s23 = sphi %s1946_s23, %s2319_s23   ;;  %s1889_s22 = sphi %s1944_s22, %s2318_s22   ;;  %s1885_s21 = sphi %s1942_s21, %s2317_s21  }
   0x7   : > { %s197_s26 = sshll.u32 %s1899_s25, 4  ;;  %p1224_p0 = scmp.ge.s32.totalorder %s1897_s24, 1  ;;  %s198_s26 = int_to_ptr.vmem [resolvable:$true] %s197_s26 }
   0x8   : > { %p1966_p1 = scmp.eq.s32.totalorder %s1222_s27, 0  ;;  %p184_p2 = scmp.lt.s32.totalorder %s1897_s24, 3 }
   0x9   : > { %s1900_s30 = smov [#allocation7]   ;;  %s1901_s9 = smov [#allocation6]  }
   0xa   : > { %s2308_s28 = scalar_select %p1966_p1, 1, 0 }
   0xb   : > { %p1971_p3 = pnand %p1224_p0, %p184_p2  ;;  %s220_s7 = sshll.u32 %s1900_s30, 4  ;;  %s1983_s7 = int_to_ptr.vmem [resolvable:$true] %s220_s7 }
   0xc   : > { %s207_s10 = sshll.u32 %s1901_s9, 4  ;;  %s1704_s12 = scalar_lea.vmem %s198_s26, 48  ;;  %s1985_s10 = int_to_ptr.vmem [resolvable:$true] %s207_s10 }
   0xd   : > { %s2309_s29 = scalar_select %p1971_p3, 1, 0 }
   0xe   : > { %p1623_p4 = pneg %p1971_p3  ;;  %p1705_p7 = scmp.ne.s32.totalorder %s198_s26, %s1704_s12 }
   0xf   : > { %s1711_s13 = scalar_lea.vmem %s198_s26, 64  ;;  %p1712_p10 = scmp.lt.s32.totalorder %s198_s26, %s198_s26 }
  0x10   : > { %p1979_p5 = pnand %p1623_p4, %p1966_p1  ;;  %p1713_p11 = scmp.lt.s32.totalorder %s1711_s13, %s1704_s12 }
  0x12   : > { %p1989_p6 = pneg %p1979_p5  ;;  %p1714_p12 = por %p1713_p11, %p1712_p10 }
  0x14   : > { %p1707_p8 = pnand %p1705_p7, %p1989_p6 }
  0x16   : > { %p1708_p9 = pneg %p1707_p8 }
  0x18   : > { %p1715_p13 = pnand %p1714_p12, %p1708_p9 }
  0x1a   : > { %1718 = shalt.err (!%p1715_p13)
}
  0x1b   : > { %1626 = dma.hbm_to_vmem [thread:$0]  (!%p1979_p5), %s2298_s1, 48, %s198_s26, [#allocation5]  }
  0x1c   : > { %s1730_s16 = scalar_lea.vmem %s1983_s7, 2048  ;;  %p1738_p7 = scmp.lt.s32.totalorder %s1983_s7, %s1983_s7 }
  0x1d   : > { %p1731_p0 = scmp.ne.s32.totalorder %s1983_s7, %s1730_s16  ;;  %p1739_p8 = scmp.lt.s32.totalorder %s1730_s16, %s1730_s16 }
  0x1f   : > { %p1733_p2 = pnand %p1731_p0, %p1989_p6  ;;  %p1740_p9 = por %p1739_p8, %p1738_p7 }
  0x21   : > { %p1734_p4 = pneg %p1733_p2 }
  0x23   : > { %p1741_p10 = pnand %p1740_p9, %p1734_p4 }
  0x25   : > { %1744 = shalt.err (!%p1741_p10)
}
  0x26   : > { %s1902_s17 = smov 128   ;;  %s1903_s18 = smov 8  }
  0x27   : > { %1632 = dma.hbm_to_vmem [thread:$0]  (!%p1979_p5), %s2300_s3, 2048, %s1983_s7, [#allocation8], %s1902_s17, %s1902_s17, %s1903_s18  }
  0x28   : > { %s1756_s25 = scalar_lea.vmem %s1985_s10, 2048  ;;  %p1764_p0 = scmp.lt.s32.totalorder %s1985_s10, %s1985_s10 }
  0x29   : > { %p1757_p11 = scmp.ne.s32.totalorder %s1985_s10, %s1756_s25  ;;  %p1765_p2 = scmp.lt.s32.totalorder %s1756_s25, %s1756_s25 }
  0x2b   : > { %p1759_p12 = pnand %p1757_p11, %p1989_p6  ;;  %p1766_p4 = por %p1765_p2, %p1764_p0 }
  0x2d   : > { %p1760_p13 = pneg %p1759_p12 }
  0x2f   : > { %p1767_p7 = pnand %p1766_p4, %p1760_p13 }
  0x31   : > { %1770 = shalt.err (!%p1767_p7)
}
  0x32   : > { %1629 = dma.hbm_to_vmem [thread:$0]  (!%p1979_p5), %s2299_s2, 2048, %s1985_s10, [#allocation5], %s1902_s17, %s1902_s17, %s1903_s18  }
  0x33   : > { %s1904_s7 = smov [#allocation9]   ;;  %s1905_s12 = smov [#allocation10]  }
  0x34   : > { %s233_s9 = sshll.u32 %s1904_s7, 4  ;;  %s246_s13 = sshll.u32 %s1905_s12, 4  ;;  %s234_s9 = int_to_ptr.vmem [resolvable:$true] %s233_s9  ;;  %s247_s13 = int_to_ptr.vmem [resolvable:$true] %s246_s13 }
  0x35   : > { %s1782_s14 = scalar_lea.vmem %s234_s9, 2048  ;;  %p1790_p11 = scmp.lt.s32.totalorder %s234_s9, %s234_s9 }
  0x36   : > { %p1783_p8 = scmp.ne.s32.totalorder %s234_s9, %s1782_s14  ;;  %p1791_p12 = scmp.lt.s32.totalorder %s1782_s14, %s1782_s14 }
  0x38   : > { %p1785_p9 = pnand %p1783_p8, %p1989_p6  ;;  %p1792_p13 = por %p1791_p12, %p1790_p11 }
  0x3a   : > { %p1786_p10 = pneg %p1785_p9 }
  0x3c   : > { %p1793_p0 = pnand %p1792_p13, %p1786_p10 }
  0x3e   : > { %1796 = shalt.err (!%p1793_p0)
}
  0x3f   : > { %1635 = dma.hbm_to_vmem [thread:$0]  (!%p1979_p5), %s2301_s4, 2048, %s234_s9, [#allocation8], %s1902_s17, %s1902_s17, %s1903_s18  }
  0x40   : > { %s1808_s16 = scalar_lea.vmem %s247_s13, 2048  ;;  %p1816_p8 = scmp.lt.s32.totalorder %s247_s13, %s247_s13 }
  0x41   : > { %p1809_p2 = scmp.ne.s32.totalorder %s247_s13, %s1808_s16  ;;  %p1817_p9 = scmp.lt.s32.totalorder %s1808_s16, %s1808_s16 }
  0x43   : > { %p1811_p4 = pnand %p1809_p2, %p1989_p6  ;;  %p1818_p10 = por %p1817_p9, %p1816_p8 }
  0x45   : > { %p1812_p7 = pneg %p1811_p4 }
  0x47   : > { %p1819_p11 = pnand %p1818_p10, %p1812_p7 }
  0x49   : > { %1822 = shalt.err (!%p1819_p11)
}
  0x4a   : > { %1638 = dma.hbm_to_vmem [thread:$0]  (!%p1979_p5), %s2302_s5, 2048, %s247_s13, [#allocation11], %s1902_s17, %s1902_s17, %s1903_s18  }
  0x4b   : > { %s2051_s8 = sadd.s32 1, %s1897_s24   ;;  %s29_s25 = sadd.s32 1, %s1893_s23 }
  0x4c   : > { %s26_s11 = ssub.s32 %s1897_s24, %s2051_s8  ;;  %p36_p12 = scmp.ne.s32.totalorder %s1893_s23, %s1889_s22 }
  0x4d   : > { %p27_p6 = scmp.eq.s32.totalorder %s26_s11, 0  ;;  %p37_p13 = scmp.eq.s32.totalorder %s1897_s24, 0 }
  0x4e   : > { %p42_p0 = scmp.ne.s32.totalorder %s1889_s22, %s1885_s21  ;;  %p1648_p7 = scmp.lt.s32.totalorder %s1897_s24, 2 }
  0x4f   : > { %s2062_s26 = scalar_select %p27_p6, %s1893_s23, %s29_s25  }
  0x50   : > { %p38_p2 = por %p37_p13, %p36_p12  ;;  %p2066_p4 = por %p1966_p1, %p42_p0 }
  0x51   : > { %s260_s7 = sand.u32 1, %s1893_s23   ;;  %s1248_s12 = sshll.u32 %s1897_s24, 11 }
  0x52   : > { %s2312_s30 = scalar_select %p2066_p4, 1, 0 }
  0x53   : > { %s1231_s9 = sshll.u32 %s260_s7, 7  ;;  %s2076_s10 = scalar_lea.hbm %s2297_s0, %s1248_s12 }
  0x54   : > { %s264_s21 = scalar_lea.vmem [#allocation2], %s1231_s9  ;;  %p2080_p5 = pnand %p1648_p7, %p38_p2 }
  0x55   : > { %s271_s15 = sshll.u32 %s264_s21, 4  ;;  %s2084_s19 = scalar_lea.sflag [#allocation3], %s260_s7  ;;  %s2078_s15 = int_to_ptr.vmem [resolvable:$true] %s271_s15 }
  0x56   : > { %s1823_s20 = scalar_lea.hbm %s2076_s10, 2048  ;;  %p1825_p9 = pneg %p2080_p5 }
  0x57   : > { %p1824_p8 = scmp.ne.s32.totalorder %s2076_s10, %s1823_s20  ;;  %s1828_s9 = scalar_lea.hbm %s2297_s0, 4096 }
  0x58   : > { %p1829_p6 = scmp.lt.s32.totalorder %s2076_s10, %s2297_s0  ;;  %p1830_p12 = scmp.lt.s32.totalorder %s1828_s9, %s1823_s20 }
  0x59   : > { %p1826_p10 = pnand %p1825_p9, %p1824_p8 }
  0x5a   : > { %p1831_p13 = por %p1830_p12, %p1829_p6 }
  0x5b   : > { %p1827_p11 = pneg %p1826_p10 }
  0x5d   : > { %p1832_p0 = pnand %p1831_p13, %p1827_p11 }
  0x5f   : > { %1835 = shalt.err (!%p1832_p0)
}
  0x60   : > { %s1836_s7 = scalar_lea.vmem %s2078_s15, 2048  ;;  %s1906_s14 = smov [#allocation2]  }
  0x61   : > { %p1837_p2 = scmp.ne.s32.totalorder %s2078_s15, %s1836_s7  ;;  %s1841_s21 = sshll.u32 %s1906_s14, 4  ;;  %s1842_s21 = int_to_ptr.vmem [resolvable:$false] %s1841_s21 }
  0x62   : > { %s1843_s11 = scalar_lea.vmem %s1842_s21, 4096  ;;  %p1844_p10 = scmp.lt.s32.totalorder %s2078_s15, %s1842_s21 }
  0x63   : > { %p1839_p7 = pnand %p1837_p2, %p1825_p9  ;;  %p1845_p1 = scmp.lt.s32.totalorder %s1843_s11, %s1836_s7 }
  0x65   : > { %p1840_p8 = pneg %p1839_p7  ;;  %p1846_p4 = por %p1845_p1, %p1844_p10 }
  0x67   : > { %p1847_p3 = pnand %p1846_p4, %p1840_p8 }
  0x69   : > { %1850 = shalt.err (!%p1847_p3)
}
  0x6a   : > { %1642 = dma.hbm_to_vmem [thread:$0]  (!%p2080_p5), %s2076_s10, 2048, %s2078_s15, %s2084_s19, %s1902_s17, %s1902_s17, %s1903_s18  }
  0x6b   : > { %p2314_p9 = scmp.ne.s32.totalorder %s2309_s29, 0 }
  0x6c   : > { %s285_s20 = sand.u32 (!%p2314_p9), 1, %s1889_s22   ;;  %p2315_p1 = scmp.ne.s32.totalorder (!%p2314_p9), %s2312_s30, 0 }
  0x6d   : > { %283 = sbr.rel (%p2314_p9) target bundleno = 781 (0x30d), region = 44  ;;  %s1235_s25 = sshll.u32 (!%p2314_p9), %s285_s20, 7 }
  0x6e   : > { %s286_s9 = scalar_lea.sflag (!%p2314_p9), [#allocation3], %s285_s20  ;;  %s2111_s12 = scalar_lea.vmem (!%p2314_p9), [#allocation2], %s1235_s25 }
  0x72   : > { %1868 = dma.done.wait (%p2315_p1), %s286_s9, 2048  }
  0x73   : > { %1870 = vsyncadd (%p2315_p1), %s286_s9, 4294965248  ;;  %p2316_p3 = scmp.ne.s32.totalorder %s2308_s28, 0 }
  0x75   : > { %1872 = dma.done.wait (%p2316_p3), [#allocation5], 2096  }
  0x76   : > { %1874 = vsyncadd (%p2316_p3), [#allocation5], 4294965200 }
  0x77   : > { %1876 = dma.done.wait (%p2316_p3), [#allocation8], 4096  }
  0x78   : > { %1878 = vsyncadd (%p2316_p3), [#allocation8], 4294963200 }
  0x79   : > { %1880 = dma.done.wait (%p2316_p3), [#allocation11], 2048  }
  0x7a   : > { %1882 = vsyncadd (%p2316_p3), [#allocation11], 4294965248  ;;  %v377_v0 = vld [vmem:[#allocation7 + $0x78] sm:$0xff]  ;;  %v376_v1 = vld [vmem:[#allocation7 + $0x70] sm:$0xff]  ;;  %s1241_s28 = sshll.u32 %s1222_s27, 4  ;;  %vm1090_vm0 = vcmask 64512  }
  0x7b   : > { %1377 = vmatprep.subr.mxu0 %v377_v0  ;;  %v375_v2 = vld [vmem:[#allocation7 + $0x68] sm:$0xff]  ;;  %v374_v3 = vld [vmem:[#allocation7 + $0x60] sm:$0xff]  ;;  %v373_v5 = vld [vmem:[#allocation7 + $0x58] sm:$0xff]  ;;  %p340_p4 = scmp.lt.s32.totalorder %s1241_s28, 31 }
  0x7c   : > { %1378 = vmatpush3.msra.mxu0 %v377_v0  ;;  %v2130_v4 = vld [vmem:[%s2111_s12] sm:$0xff]  ;;  %v372_v6 = vld [vmem:[#allocation7 + $0x50] sm:$0xff]  ;;  %v371_v7 = vld [vmem:[#allocation7 + $0x48] sm:$0xff] }
  0x7d   : > { %1379 = vmatprep.subr.mxu0 %v376_v1  ;;  %1409 = vmatprep.mubr.f32.mxu0 %v2130_v4  ;;  %v561_v8 = vld [vmem:[#allocation9 + $0x78] sm:$0xff]  ;;  %v560_v9 = vld [vmem:[#allocation9 + $0x70] sm:$0xff]  ;;  %v370_v10 = vld [vmem:[#allocation7 + $0x40] sm:$0xff]  ;;  %s2322_s28 = smov (!%p340_p4, %s1241_s28), 31 }
  0x7e   : > { %1380 = vmatpush3.msra.mxu0 %v376_v1  ;;  %1433 = vmatprep.subr.mxu1 %v561_v8  ;;  %v559_v11 = vld [vmem:[#allocation9 + $0x68] sm:$0xff]  ;;  %v369_v12 = vld [vmem:[#allocation7 + $0x38] sm:$0xff]  ;;  %v558_v13 = vld [vmem:[#allocation9 + $0x60] sm:$0xff]  ;;  %s1242_s29 = sshll.u32 %s2322_s28, 3 }
  0x7f   : > { %1381 = vmatprep.subr.mxu0 %v375_v2  ;;  %1434 = vmatpush3.msra.mxu1 %v561_v8  ;;  %v368_v14 = vld [vmem:[#allocation7 + $0x30] sm:$0xff]  ;;  %v557_v15 = vld [vmem:[#allocation9 + $0x58] sm:$0xff]  ;;  %v367_v16 = vld [vmem:[#allocation7 + $0x28] sm:$0xff]  ;;  %s2237_s24 = scalar_lea.vmem %s2303_s6, %s1242_s29 }
  0x80   : > { %1382 = vmatpush3.msra.mxu0 %v375_v2  ;;  %1435 = vmatprep.subr.mxu1 %v560_v9  ;;  %v556_v17 = vld [vmem:[#allocation9 + $0x50] sm:$0xff]  ;;  %v366_v18 = vld [vmem:[#allocation7 + $0x20] sm:$0xff]  ;;  %v555_v19 = vld [vmem:[#allocation9 + $0x48] sm:$0xff] }
  0x81   : > { %1383 = vmatprep.subr.mxu0 %v374_v3  ;;  %1436 = vmatpush3.msra.mxu1 %v560_v9  ;;  %v365_v20 = vld [vmem:[#allocation7 + $0x18] sm:$0xff]  ;;  %v554_v21 = vld [vmem:[#allocation9 + $0x40] sm:$0xff]  ;;  %v364_v22 = vld [vmem:[#allocation7 + $0x10] sm:$0xff] }
  0x82   : > { %1384 = vmatpush3.msra.mxu0 %v374_v3  ;;  %1437 = vmatprep.subr.mxu1 %v559_v11  ;;  %v553_v23 = vld [vmem:[#allocation9 + $0x38] sm:$0xff]  ;;  %v363_v24 = vld [vmem:[#allocation7 + $0x8] sm:$0xff]  ;;  %v552_v25 = vld [vmem:[#allocation9 + $0x30] sm:$0xff] }
  0x83   : > { %1385 = vmatprep.subr.mxu0 %v373_v5  ;;  %1438 = vmatpush3.msra.mxu1 %v559_v11  ;;  %v362_v26 = vld [vmem:[#allocation7] sm:$0xff]  ;;  %v551_v27 = vld [vmem:[#allocation9 + $0x28] sm:$0xff]  ;;  %v2142_v31 = vld [vmem:[%s2111_s12 + $0x18] sm:$0xff] }
  0x84   : > { %1386 = vmatpush3.msra.mxu0 %v373_v5  ;;  %1439 = vmatprep.subr.mxu1 %v558_v13  ;;  %v2134_v28 = vld [vmem:[%s2111_s12 + $0x8] sm:$0xff]  ;;  %v2137_v30 = vld [vmem:[%s2111_s12 + $0x10] sm:$0xff]  ;;  %v2145_v32 = vld [vmem:[%s2111_s12 + $0x20] sm:$0xff] }
  0x85   : > { %1387 = vmatprep.subr.mxu0 %v372_v6  ;;  %1440 = vmatpush3.msra.mxu1 %v558_v13  ;;  %v550_v29 = vld [vmem:[#allocation9 + $0x20] sm:$0xff]  ;;  %v2153_v34 = vld [vmem:[%s2111_s12 + $0x30] sm:$0xff]  ;;  %v2158_v35 = vld [vmem:[%s2111_s12 + $0x38] sm:$0xff] }
  0x86   : > { %1388 = vmatpush3.msra.mxu0 %v372_v6  ;;  %1441 = vmatprep.subr.mxu1 %v557_v15  ;;  %v2150_v33 = vld [vmem:[%s2111_s12 + $0x28] sm:$0xff]  ;;  %v2161_v36 = vld [vmem:[%s2111_s12 + $0x40] sm:$0xff]  ;;  %v2169_v38 = vld [vmem:[%s2111_s12 + $0x50] sm:$0xff] }
  0x87   : > { %1389 = vmatprep.subr.mxu0 %v371_v7  ;;  %1442 = vmatpush3.msra.mxu1 %v557_v15  ;;  %v2166_v37 = vld [vmem:[%s2111_s12 + $0x48] sm:$0xff]  ;;  %v2174_v39 = vld [vmem:[%s2111_s12 + $0x58] sm:$0xff]  ;;  %v2177_v40 = vld [vmem:[%s2111_s12 + $0x60] sm:$0xff] }
  0x88   : > { %1390 = vmatpush3.msra.mxu0 %v371_v7  ;;  %1443 = vmatprep.subr.mxu1 %v556_v17  ;;  %v2182_v41 = vld [vmem:[%s2111_s12 + $0x68] sm:$0xff]  ;;  %v2185_v42 = vld [vmem:[%s2111_s12 + $0x70] sm:$0xff]  ;;  %v2190_v43 = vld [vmem:[%s2111_s12 + $0x78] sm:$0xff] }
  0x89   : > { %1391 = vmatprep.subr.mxu0 %v370_v10  ;;  %1444 = vmatpush3.msra.mxu1 %v556_v17  ;;  %v549_v44 = vld [vmem:[#allocation9 + $0x18] sm:$0xff]  ;;  %v548_v45 = vld [vmem:[#allocation9 + $0x10] sm:$0xff]  ;;  %v547_v46 = vld [vmem:[#allocation9 + $0x8] sm:$0xff] }
  0x8a   : > { %1392 = vmatpush3.msra.mxu0 %v370_v10  ;;  %1445 = vmatprep.subr.mxu1 %v555_v19  ;;  %v546_v47 = vld [vmem:[#allocation9] sm:$0xff]  ;;  %v905_v48 = vld [vmem:[#allocation6 + $0x78] sm:$0xff]  ;;  %v743_v50 = vld [vmem:[#allocation10 + $0x70] sm:$0xff] }
  0x8b   : > { %1393 = vmatprep.subr.mxu0 %v369_v12  ;;  %1446 = vmatpush3.msra.mxu1 %v555_v19  ;;  %v744_v49 = vld [vmem:[#allocation10 + $0x78] sm:$0xff]  ;;  %v742_v51 = vld [vmem:[#allocation10 + $0x68] sm:$0xff]  ;;  %v741_v52 = vld [vmem:[#allocation10 + $0x60] sm:$0xff] }
  0x8c   : > { %1394 = vmatpush3.msra.mxu0 %v369_v12  ;;  %1447 = vmatprep.subr.mxu1 %v554_v21  ;;  %v740_v53 = vld [vmem:[#allocation10 + $0x58] sm:$0xff]  ;;  %v739_v54 = vld [vmem:[#allocation10 + $0x50] sm:$0xff]  ;;  %v738_v55 = vld [vmem:[#allocation10 + $0x48] sm:$0xff] }
  0x8d   : > { %1395 = vmatprep.subr.mxu0 %v368_v14  ;;  %1448 = vmatpush3.msra.mxu1 %v554_v21  ;;  %v737_v56 = vld [vmem:[#allocation10 + $0x40] sm:$0xff]  ;;  %v736_v57 = vld [vmem:[#allocation10 + $0x38] sm:$0xff]  ;;  %v735_v58 = vld [vmem:[#allocation10 + $0x30] sm:$0xff] }
  0x8e   : > { %1396 = vmatpush3.msra.mxu0 %v368_v14  ;;  %1449 = vmatprep.subr.mxu1 %v553_v23  ;;  %v734_v59 = vld [vmem:[#allocation10 + $0x28] sm:$0xff]  ;;  %v733_v60 = vld [vmem:[#allocation10 + $0x20] sm:$0xff]  ;;  %v732_v61 = vld [vmem:[#allocation10 + $0x18] sm:$0xff] }
  0x8f   : > { %1397 = vmatprep.subr.mxu0 %v367_v16  ;;  %1450 = vmatpush3.msra.mxu1 %v553_v23  ;;  %v2193_v62 = vld [vmem:[#allocation4 + $0x1] ss:$0 sm:$0xff]  ;;  %v904_v10 = vld [vmem:[#allocation6 + $0x70] sm:$0xff]  ;;  %v903_v13 = vld [vmem:[#allocation6 + $0x68] sm:$0xff] }
  0x90   : > { %1398 = vmatpush3.msra.mxu0 %v367_v16  ;;  %1451 = vmatprep.subr.mxu1 %v552_v25  ;;  %v901_v21 = vld [vmem:[#allocation6 + $0x58] sm:$0xff] }
  0x91   : > { %1399 = vmatprep.subr.mxu0 %v366_v18  ;;  %1452 = vmatpush3.msra.mxu1 %v552_v25 }
  0x92   : > { %1400 = vmatpush3.msra.mxu0 %v366_v18  ;;  %1453 = vmatprep.subr.mxu1 %v551_v27  ;;  %v902_v18 = vld [vmem:[#allocation6 + $0x60] sm:$0xff] }
  0x93   : > { %1401 = vmatprep.subr.mxu0 %v365_v20  ;;  %1454 = vmatpush3.msra.mxu1 %v551_v27 }
  0x94   : > { %1402 = vmatpush3.msra.mxu0 %v365_v20  ;;  %1455 = vmatprep.subr.mxu1 %v550_v29 }
  0x95   : > { %1403 = vmatprep.subr.mxu0 %v364_v22  ;;  %1456 = vmatpush3.msra.mxu1 %v550_v29 }
  0x96   : > { %1404 = vmatpush3.msra.mxu0 %v364_v22  ;;  %1457 = vmatprep.subr.mxu1 %v549_v44 }
  0x97   : > { %1405 = vmatprep.subr.mxu0 %v363_v24  ;;  %1458 = vmatpush3.msra.mxu1 %v549_v44  ;;  %v899_v44 = vld [vmem:[#allocation6 + $0x48] sm:$0xff] }
  0x98   : > { %1406 = vmatpush3.msra.mxu0 %v363_v24  ;;  %1459 = vmatprep.subr.mxu1 %v548_v45 }
  0x99   : > { %1407 = vmatprep.subr.mxu0 %v362_v26  ;;  %1460 = vmatpush3.msra.mxu1 %v548_v45 }
  0x9a   : > { %1408 = vmatpush3.msra.mxu0 %v362_v26  ;;  %1461 = vmatprep.subr.mxu1 %v547_v46  ;;  %v900_v26 = vld [vmem:[#allocation6 + $0x50] sm:$0xff] }
  0x9b   : > { %1410 = vmatmul.mubr.f32.vlgmr.msra.gmra.mxu0 %v2134_v28  ;;  %1462 = vmatpush3.msra.mxu1 %v547_v46 }
  0x9c   : > { %1412 = vmatprep.mubr.f32.mxu0 %v2137_v30  ;;  %1463 = vmatprep.subr.mxu1 %v546_v47 }
  0x9d   : > { %1464 = vmatpush3.msra.mxu1 %v546_v47  ;;  %1489 = vmatprep.subr.mxu0 %v744_v49 }
  0x9e   : > { %1545 = vmatprep.subr.mxu1 %v905_v48  ;;  %1490 = vmatpush3.msra.mxu0 %v744_v49  ;;  %v898_v49 = vld [vmem:[#allocation6 + $0x40] sm:$0xff] }
  0x9f   : > { %1413 = vmatmul.mubr.f32.gmra.mxu0 %v2142_v31  ;;  %1491 = vmatprep.subr.mxu0 %v743_v50 }
  0xa0   : > { %1415 = vmatprep.mubr.f32.mxu0 %v2145_v32  ;;  %1492 = vmatpush3.msra.mxu0 %v743_v50 }
  0xa1   : > { %1493 = vmatprep.subr.mxu0 %v742_v51 }
  0xa2   : > { %1494 = vmatpush3.msra.mxu0 %v742_v51 }
  0xa3   : > { %1416 = vmatmul.mubr.f32.gmra.mxu0 %v2150_v33  ;;  %1495 = vmatprep.subr.mxu0 %v741_v52 }
  0xa4   : > { %1418 = vmatprep.mubr.f32.mxu0 %v2153_v34  ;;  %1496 = vmatpush3.msra.mxu0 %v741_v52  ;;  %v897_v52 = vld [vmem:[#allocation6 + $0x38] sm:$0xff] }
  0xa5   : > { %1497 = vmatprep.subr.mxu0 %v740_v53 }
  0xa6   : > { %1498 = vmatpush3.msra.mxu0 %v740_v53 }
  0xa7   : > { %1419 = vmatmul.mubr.f32.gmra.mxu0 %v2158_v35  ;;  %1499 = vmatprep.subr.mxu0 %v739_v54 }
  0xa8   : > { %1421 = vmatprep.mubr.f32.mxu0 %v2161_v36  ;;  %1500 = vmatpush3.msra.mxu0 %v739_v54 }
  0xa9   : > { %1501 = vmatprep.subr.mxu0 %v738_v55 }
  0xaa   : > { %1502 = vmatpush3.msra.mxu0 %v738_v55 }
  0xab   : > { %1422 = vmatmul.mubr.f32.gmra.mxu0 %v2166_v37  ;;  %1503 = vmatprep.subr.mxu0 %v737_v56 }
  0xac   : > { %1424 = vmatprep.mubr.f32.mxu0 %v2169_v38  ;;  %1504 = vmatpush3.msra.mxu0 %v737_v56 }
  0xad   : > { %1505 = vmatprep.subr.mxu0 %v736_v57 }
  0xae   : > { %1506 = vmatpush3.msra.mxu0 %v736_v57  ;;  %v896_v57 = vld [vmem:[#allocation6 + $0x30] sm:$0xff] }
  0xaf   : > { %1425 = vmatmul.mubr.f32.gmra.mxu0 %v2174_v39  ;;  %1507 = vmatprep.subr.mxu0 %v735_v58 }
  0xb0   : > { %1427 = vmatprep.mubr.f32.mxu0 %v2177_v40  ;;  %1508 = vmatpush3.msra.mxu0 %v735_v58 }
  0xb1   : > { %1509 = vmatprep.subr.mxu0 %v734_v59 }
  0xb2   : > { %1510 = vmatpush3.msra.mxu0 %v734_v59 }
  0xb3   : > { %1428 = vmatmul.mubr.f32.gmra.mxu0 %v2182_v41  ;;  %1511 = vmatprep.subr.mxu0 %v733_v60 }
  0xb4   : > { %1430 = vmatprep.mubr.f32.mxu0 %v2185_v42  ;;  %1512 = vmatpush3.msra.mxu0 %v733_v60  ;;  %v895_v60 = vld [vmem:[#allocation6 + $0x28] sm:$0xff] }
  0xb5   : > { %1513 = vmatprep.subr.mxu0 %v732_v61 }
  0xb6   : > { %1514 = vmatpush3.msra.mxu0 %v732_v61 }
  0xb7   : > { %1431 = vmatmul.mubr.f32.gmra.mxu0 %v2190_v43 }
 0x15b   : > { %v1411_v63 = vpop.f32.mrf.mxu0 }
 0x15c   : > { %v456_v0 = vadd.f32 %v1411_v63, %v2193_v62 }
 0x15d   : > { %v450_v1 = vpop.f32.mrf.mxu0 }
 0x15e   : > { %v451_v2 = vadd.f32 %v2193_v62, %v450_v1  ;;  %v530_v6 = vmax.f32 %v456_v0, 0.0 }
 0x15f   : > { %v1414_v3 = vpop.f32.mrf.mxu0 }
 0x160   : > { %v529_v5 = vmax.f32 %v451_v2, 0.0  ;;  %v466_v7 = vadd.f32 %v1414_v3, %v2193_v62  ;;  %v894_v2 = vld [vmem:[#allocation6 + $0x20] sm:$0xff] }
 0x161   : > { %v460_v8 = vpop.f32.mrf.mxu0 }
 0x162   : > { %v461_v9 = vadd.f32 %v2193_v62, %v460_v8  ;;  %1465 = vmatprep.mubr.f32.mxu1 %v529_v5  ;;  %v532_v14 = vmax.f32 %v466_v7, 0.0 }
 0x163   : > { %v1417_v11 = vpop.f32.mrf.mxu0  ;;  %1466 = vmatmul.mubr.f32.vlgmr.msra.gmra.mxu1 %v530_v6  ;;  %v893_v6 = vld [vmem:[#allocation6 + $0x18] sm:$0xff] }
 0x164   : > { %v531_v12 = vmax.f32 %v461_v9, 0.0  ;;  %1546 = vmatpush3.msra.mxu1 %v905_v48  ;;  %v476_v15 = vadd.f32 %v1417_v11, %v2193_v62  ;;  %v892_v11 = vld [vmem:[#allocation6 + $0x10] sm:$0xff] }
 0x165   : > { %v470_v16 = vpop.f32.mrf.mxu0  ;;  %1547 = vmatprep.subr.mxu1 %v904_v10 }
 0x166   : > { %v471_v17 = vadd.f32 %v2193_v62, %v470_v16  ;;  %1468 = vmatprep.mubr.f32.mxu1 %v531_v12  ;;  %1548 = vmatpush3.msra.mxu1 %v904_v10  ;;  %v534_v22 = vmax.f32 %v476_v15, 0.0  ;;  %v890_v15 = vld [vmem:[#allocation6] sm:$0xff]  ;;  %v730_v16 = vld [vmem:[#allocation10 + $0x8] sm:$0xff] }
 0x167   : > { %v1420_v19 = vpop.f32.mrf.mxu0  ;;  %1469 = vmatmul.mubr.f32.gmra.mxu1 %v532_v14  ;;  %1549 = vmatprep.subr.mxu1 %v903_v13 }
 0x168   : > { %v533_v20 = vmax.f32 %v471_v17, 0.0  ;;  %1550 = vmatpush3.msra.mxu1 %v903_v13  ;;  %v486_v23 = vadd.f32 %v1420_v19, %v2193_v62  ;;  %v891_v13 = vld [vmem:[#allocation6 + $0x8] sm:$0xff]  ;;  %v729_v17 = vld [vmem:[#allocation10] sm:$0xff] }
 0x169   : > { %v480_v24 = vpop.f32.mrf.mxu0  ;;  %1551 = vmatprep.subr.mxu1 %v902_v18 }
 0x16a   : > { %v481_v25 = vadd.f32 %v2193_v62, %v480_v24  ;;  %1471 = vmatprep.mubr.f32.mxu1 %v533_v20  ;;  %1552 = vmatpush3.msra.mxu1 %v902_v18  ;;  %v536_v45 = vmax.f32 %v486_v23, 0.0 }
 0x16b   : > { %v1423_v27 = vpop.f32.mrf.mxu0  ;;  %1472 = vmatmul.mubr.f32.gmra.mxu1 %v534_v22  ;;  %1553 = vmatprep.subr.mxu1 %v901_v21 }
 0x16c   : > { %v535_v29 = vmax.f32 %v481_v25, 0.0  ;;  %1554 = vmatpush3.msra.mxu1 %v901_v21  ;;  %v496_v46 = vadd.f32 %v1423_v27, %v2193_v62 }
 0x16d   : > { %v490_v47 = vpop.f32.mrf.mxu0  ;;  %1555 = vmatprep.subr.mxu1 %v900_v26 }
 0x16e   : > { %v491_v48 = vadd.f32 %v2193_v62, %v490_v47  ;;  %1474 = vmatprep.mubr.f32.mxu1 %v535_v29  ;;  %1556 = vmatpush3.msra.mxu1 %v900_v26  ;;  %v538_v53 = vmax.f32 %v496_v46, 0.0 }
 0x16f   : > { %v1426_v50 = vpop.f32.mrf.mxu0  ;;  %1475 = vmatmul.mubr.f32.gmra.mxu1 %v536_v45  ;;  %1557 = vmatprep.subr.mxu1 %v899_v44 }
 0x170   : > { %v537_v51 = vmax.f32 %v491_v48, 0.0  ;;  %1558 = vmatpush3.msra.mxu1 %v899_v44  ;;  %v506_v54 = vadd.f32 %v1426_v50, %v2193_v62 }
 0x171   : > { %v500_v55 = vpop.f32.mrf.mxu0  ;;  %1559 = vmatprep.subr.mxu1 %v898_v49 }
 0x172   : > { %v501_v56 = vadd.f32 %v2193_v62, %v500_v55  ;;  %1477 = vmatprep.mubr.f32.mxu1 %v537_v51  ;;  %1560 = vmatpush3.msra.mxu1 %v898_v49  ;;  %v540_v61 = vmax.f32 %v506_v54, 0.0 }
 0x173   : > { %v1429_v58 = vpop.f32.mrf.mxu0  ;;  %1478 = vmatmul.mubr.f32.gmra.mxu1 %v538_v53  ;;  %1561 = vmatprep.subr.mxu1 %v897_v52 }
 0x174   : > { %v539_v59 = vmax.f32 %v501_v56, 0.0  ;;  %1562 = vmatpush3.msra.mxu1 %v897_v52  ;;  %v516_v63 = vadd.f32 %v1429_v58, %v2193_v62 }
 0x175   : > { %v510_v0 = vpop.f32.mrf.mxu0  ;;  %1563 = vmatprep.subr.mxu1 %v896_v57 }
 0x176   : > { %v511_v1 = vadd.f32 %v2193_v62, %v510_v0  ;;  %1480 = vmatprep.mubr.f32.mxu1 %v539_v59  ;;  %1564 = vmatpush3.msra.mxu1 %v896_v57  ;;  %v542_v7 = vmax.f32 %v516_v63, 0.0 }
 0x177   : > { %v1432_v3 = vpop.f32.mrf.mxu0  ;;  %1481 = vmatmul.mubr.f32.gmra.mxu1 %v540_v61  ;;  %1565 = vmatprep.subr.mxu1 %v895_v60 }
 0x178   : > { %v541_v5 = vmax.f32 %v511_v1, 0.0  ;;  %1566 = vmatpush3.msra.mxu1 %v895_v60  ;;  %v526_v8 = vadd.f32 %v1432_v3, %v2193_v62 }
 0x179   : > { %v520_v9 = vpop.f32.mrf.mxu0  ;;  %1567 = vmatprep.subr.mxu1 %v894_v2 }
 0x17a   : > { %v521_v10 = vadd.f32 %v2193_v62, %v520_v9  ;;  %1483 = vmatprep.mubr.f32.mxu1 %v541_v5  ;;  %1568 = vmatpush3.msra.mxu1 %v894_v2  ;;  %v544_v14 = vmax.f32 %v526_v8, 0.0  ;;  %v731_v62 = vld [vmem:[#allocation10 + $0x10] sm:$0xff] }
 0x17b   : > { %1484 = vmatmul.mubr.f32.gmra.mxu1 %v542_v7  ;;  %1569 = vmatprep.subr.mxu1 %v893_v6 }
 0x17c   : > { %v543_v12 = vmax.f32 %v521_v10, 0.0  ;;  %1570 = vmatpush3.msra.mxu1 %v893_v6  ;;  %1515 = vmatprep.subr.mxu0 %v731_v62 }
 0x17d   : > { %1571 = vmatprep.subr.mxu1 %v892_v11  ;;  %1516 = vmatpush3.msra.mxu0 %v731_v62 }
 0x17e   : > { %1486 = vmatprep.mubr.f32.mxu1 %v543_v12  ;;  %1572 = vmatpush3.msra.mxu1 %v892_v11  ;;  %v2229_v11 = vld [vmem:[#allocation4] ss:$0 sm:$0xff] }
 0x17f   : > { %1487 = vmatmul.mubr.f32.gmra.mxu1 %v544_v14  ;;  %1573 = vmatprep.subr.mxu1 %v891_v13 }
 0x180   : > { %1574 = vmatpush3.msra.mxu1 %v891_v13  ;;  %1577 = vmatprep.mubr.f32.mxu1 %v2130_v4  ;;  %v1244_v4 = vld [vmem:[#allocation4 + $0x2] ss:$0 sm:$0xff] }
 0x181   : > { %1575 = vmatprep.subr.mxu1 %v890_v15  ;;  %1517 = vmatprep.subr.mxu0 %v730_v16 }
 0x182   : > { %1576 = vmatpush3.msra.mxu1 %v890_v15  ;;  %1518 = vmatpush3.msra.mxu0 %v730_v16 }
 0x183   : > { %1578 = vmatmul.mubr.f32.vlgmr.msra.gmra.mxu1 %v2134_v28  ;;  %1519 = vmatprep.subr.mxu0 %v729_v17 }
 0x184   : > { %1580 = vmatprep.mubr.f32.mxu1 %v2137_v30  ;;  %1520 = vmatpush3.msra.mxu0 %v729_v17 }
 0x187   : > { %1581 = vmatmul.mubr.f32.gmra.mxu1 %v2142_v31 }
 0x188   : > { %1583 = vmatprep.mubr.f32.mxu1 %v2145_v32 }
 0x18b   : > { %1584 = vmatmul.mubr.f32.gmra.mxu1 %v2150_v33 }
 0x18c   : > { %1586 = vmatprep.mubr.f32.mxu1 %v2153_v34 }
 0x18f   : > { %1587 = vmatmul.mubr.f32.gmra.mxu1 %v2158_v35 }
 0x190   : > { %1589 = vmatprep.mubr.f32.mxu1 %v2161_v36 }
 0x193   : > { %1590 = vmatmul.mubr.f32.gmra.mxu1 %v2166_v37 }
 0x194   : > { %1592 = vmatprep.mubr.f32.mxu1 %v2169_v38 }
 0x197   : > { %1593 = vmatmul.mubr.f32.gmra.mxu1 %v2174_v39 }
 0x198   : > { %1595 = vmatprep.mubr.f32.mxu1 %v2177_v40 }
 0x19b   : > { %1596 = vmatmul.mubr.f32.gmra.mxu1 %v2182_v41 }
 0x19c   : > { %1598 = vmatprep.mubr.f32.mxu1 %v2185_v42 }
 0x19f   : > { %1599 = vmatmul.mubr.f32.gmra.mxu1 %v2190_v43 }
 0x223   : > { %v1467_v28 = vpop.f32.mrf.mxu1 }
 0x224   : > { %v640_v30 = vadd.f32 %v1467_v28, %v1244_v4 }
 0x225   : > { %v634_v31 = vpop.f32.mrf.mxu1 }
 0x226   : > { %v635_v32 = vadd.f32 %v1244_v4, %v634_v31  ;;  %v714_v35 = vmax.f32 %v640_v30, 0.0 }
 0x227   : > { %v1470_v33 = vpop.f32.mrf.mxu1 }
 0x228   : > { %v713_v34 = vmax.f32 %v635_v32, 0.0  ;;  %v650_v36 = vadd.f32 %v1470_v33, %v1244_v4 }
 0x229   : > { %v644_v37 = vpop.f32.mrf.mxu1 }
 0x22a   : > { %v645_v38 = vadd.f32 %v1244_v4, %v644_v37  ;;  %1521 = vmatprep.mubr.f32.mxu0 %v713_v34  ;;  %v716_v41 = vmax.f32 %v650_v36, 0.0 }
 0x22b   : > { %v1473_v39 = vpop.f32.mrf.mxu1  ;;  %1522 = vmatmul.mubr.f32.vlgmr.msra.gmra.mxu0 %v714_v35 }
 0x22c   : > { %v715_v40 = vmax.f32 %v645_v38, 0.0  ;;  %v660_v18 = vadd.f32 %v1473_v39, %v1244_v4 }
 0x22d   : > { %v654_v42 = vpop.f32.mrf.mxu1 }
 0x22e   : > { %v655_v19 = vadd.f32 %v1244_v4, %v654_v42  ;;  %1524 = vmatprep.mubr.f32.mxu0 %v715_v40  ;;  %v718_v21 = vmax.f32 %v660_v18, 0.0 }
 0x22f   : > { %v1476_v43 = vpop.f32.mrf.mxu1  ;;  %1525 = vmatmul.mubr.f32.gmra.mxu0 %v716_v41 }
 0x230   : > { %v717_v20 = vmax.f32 %v655_v19, 0.0  ;;  %v670_v22 = vadd.f32 %v1476_v43, %v1244_v4 }
 0x231   : > { %v664_v23 = vpop.f32.mrf.mxu1 }
 0x232   : > { %v665_v24 = vadd.f32 %v1244_v4, %v664_v23  ;;  %1527 = vmatprep.mubr.f32.mxu0 %v717_v20  ;;  %v720_v27 = vmax.f32 %v670_v22, 0.0 }
 0x233   : > { %v1479_v25 = vpop.f32.mrf.mxu1  ;;  %1528 = vmatmul.mubr.f32.gmra.mxu0 %v718_v21 }
 0x234   : > { %v719_v26 = vmax.f32 %v665_v24, 0.0  ;;  %v680_v29 = vadd.f32 %v1479_v25, %v1244_v4 }
 0x235   : > { %v674_v44 = vpop.f32.mrf.mxu1 }
 0x236   : > { %v675_v45 = vadd.f32 %v1244_v4, %v674_v44  ;;  %1530 = vmatprep.mubr.f32.mxu0 %v719_v26  ;;  %v722_v48 = vmax.f32 %v680_v29, 0.0 }
 0x237   : > { %v1482_v46 = vpop.f32.mrf.mxu1  ;;  %1531 = vmatmul.mubr.f32.gmra.mxu0 %v720_v27 }
 0x238   : > { %v721_v47 = vmax.f32 %v675_v45, 0.0  ;;  %v690_v49 = vadd.f32 %v1482_v46, %v1244_v4 }
 0x239   : > { %v684_v50 = vpop.f32.mrf.mxu1 }
 0x23a   : > { %v685_v51 = vadd.f32 %v1244_v4, %v684_v50  ;;  %1533 = vmatprep.mubr.f32.mxu0 %v721_v47  ;;  %v724_v54 = vmax.f32 %v690_v49, 0.0 }
 0x23b   : > { %v1485_v52 = vpop.f32.mrf.mxu1  ;;  %1534 = vmatmul.mubr.f32.gmra.mxu0 %v722_v48 }
 0x23c   : > { %v723_v53 = vmax.f32 %v685_v51, 0.0  ;;  %v700_v55 = vadd.f32 %v1485_v52, %v1244_v4 }
 0x23d   : > { %v694_v56 = vpop.f32.mrf.mxu1 }
 0x23e   : > { %v695_v57 = vadd.f32 %v1244_v4, %v694_v56  ;;  %1536 = vmatprep.mubr.f32.mxu0 %v723_v53  ;;  %v726_v60 = vmax.f32 %v700_v55, 0.0 }
 0x23f   : > { %v1488_v58 = vpop.f32.mrf.mxu1  ;;  %1537 = vmatmul.mubr.f32.gmra.mxu0 %v724_v54 }
 0x240   : > { %v725_v59 = vmax.f32 %v695_v57, 0.0  ;;  %v710_v61 = vadd.f32 %v1488_v58, %v1244_v4 }
 0x241   : > { %v704_v63 = vpop.f32.mrf.mxu1 }
 0x242   : > { %v705_v0 = vadd.f32 %v1244_v4, %v704_v63  ;;  %1539 = vmatprep.mubr.f32.mxu0 %v725_v59  ;;  %v728_v2 = vmax.f32 %v710_v61, 0.0 }
 0x243   : > { %1540 = vmatmul.mubr.f32.gmra.mxu0 %v726_v60  ;;  %v1579_v3 = vpop.f32.mrf.mxu1 }
 0x244   : > { %v727_v1 = vmax.f32 %v705_v0, 0.0  ;;  %v985_v13 = vadd.f32 %v1579_v3, %v2229_v11 }
 0x245   : > { %v979_v5 = vpop.f32.mrf.mxu1 }
 0x246   : > { %1542 = vmatprep.mubr.f32.mxu0 %v727_v1  ;;  %v1059_v15 = vmax.f32 %v985_v13, 0.0  ;;  %v980_v62 = vadd.f32 %v2229_v11, %v979_v5 }
 0x247   : > { %1543 = vmatmul.mubr.f32.gmra.mxu0 %v728_v2  ;;  %v1582_v6 = vpop.f32.mrf.mxu1 }
 0x248   : > { %v995_v16 = vadd.f32 %v1582_v6, %v2229_v11  ;;  %v1058_v30 = vmax.f32 %v980_v62, 0.0 }
 0x249   : > { %v989_v7 = vpop.f32.mrf.mxu1 }
 0x24a   : > { %v990_v28 = vadd.f32 %v2229_v11, %v989_v7  ;;  %v1061_v31 = vmax.f32 %v995_v16, 0.0 }
 0x24b   : > { %v1585_v8 = vpop.f32.mrf.mxu1 }
 0x24c   : > { %v1005_v33 = vadd.f32 %v1585_v8, %v2229_v11  ;;  %v1060_v37 = vmax.f32 %v990_v28, 0.0 }
 0x24d   : > { %v999_v9 = vpop.f32.mrf.mxu1 }
 0x24e   : > { %v1063_v39 = vmax.f32 %v1005_v33, 0.0  ;;  %v1000_v41 = vadd.f32 %v2229_v11, %v999_v9 }
 0x24f   : > { %v1588_v10 = vpop.f32.mrf.mxu1 }
 0x250   : > { %v1015_v18 = vadd.f32 %v1588_v10, %v2229_v11  ;;  %v1062_v22 = vmax.f32 %v1000_v41, 0.0 }
 0x251   : > { %v1009_v12 = vpop.f32.mrf.mxu1 }
 0x252   : > { %v1010_v21 = vadd.f32 %v2229_v11, %v1009_v12  ;;  %v1065_v23 = vmax.f32 %v1015_v18, 0.0 }
 0x253   : > { %v1591_v14 = vpop.f32.mrf.mxu1 }
 0x254   : > { %v1025_v25 = vadd.f32 %v1591_v14, %v2229_v11  ;;  %v1064_v44 = vmax.f32 %v1010_v21, 0.0 }
 0x255   : > { %v1019_v17 = vpop.f32.mrf.mxu1 }
 0x256   : > { %v1067_v46 = vmax.f32 %v1025_v25, 0.0  ;;  %v1020_v48 = vadd.f32 %v2229_v11, %v1019_v17 }
 0x257   : > { %v1594_v35 = vpop.f32.mrf.mxu1 }
 0x258   : > { %v1035_v49 = vadd.f32 %v1594_v35, %v2229_v11  ;;  %v1066_v55 = vmax.f32 %v1020_v48, 0.0 }
 0x259   : > { %v1029_v19 = vpop.f32.mrf.mxu1 }
 0x25a   : > { %v1030_v54 = vadd.f32 %v2229_v11, %v1029_v19  ;;  %v1069_v56 = vmax.f32 %v1035_v49, 0.0 }
 0x25b   : > { %v1597_v27 = vpop.f32.mrf.mxu1 }
 0x25c   : > { %v1045_v58 = vadd.f32 %v1597_v27, %v2229_v11  ;;  %v1068_v63 = vmax.f32 %v1030_v54, 0.0 }
 0x25d   : > { %v1039_v51 = vpop.f32.mrf.mxu1 }
 0x25e   : > { %v1071_v1 = vmax.f32 %v1045_v58, 0.0  ;;  %v1040_v3 = vadd.f32 %v2229_v11, %v1039_v51 }
 0x25f   : > { %v1600_v60 = vpop.f32.mrf.mxu1 }
 0x260   : > { %v1055_v5 = vadd.f32 %v1600_v60, %v2229_v11  ;;  %v1070_v10 = vmax.f32 %v1040_v3, 0.0 }
 0x261   : > { %v1049_v7 = vpop.f32.mrf.mxu1 }
 0x262   : > { %v1073_v12 = vmax.f32 %v1055_v5, 0.0  ;;  %v1050_v14 = vadd.f32 %v2229_v11, %v1049_v7 }
 0x264   : > { %v1072_v17 = vmax.f32 %v1050_v14, 0.0 }
 0x2eb   : > { %v1523_v4 = vpop.f32.mrf.mxu0 }
 0x2ec   : > { %v1075_v32 = vadd.f32 %v1523_v4, %v1059_v15 }
 0x2ed   : > { %v811_v34 = vpop.f32.mrf.mxu0 }
 0x2ee   : > { %1092 = vst.msk [vmem:[%s2237_s24 + $0x8] sm:$0xff] %vm1090_vm0, %v1075_v32  ;;  %v1074_v36 = vadd.f32 %v1058_v30, %v811_v34 }
 0x2ef   : > { %v1526_v38 = vpop.f32.mrf.mxu0 }
 0x2f0   : > { %1091 = vst.msk [vmem:[%s2237_s24] sm:$0xff] %vm1090_vm0, %v1074_v36  ;;  %v1077_v40 = vadd.f32 %v1526_v38, %v1061_v31 }
 0x2f1   : > { %v821_v42 = vpop.f32.mrf.mxu0 }
 0x2f2   : > { %1094 = vst.msk [vmem:[%s2237_s24 + $0x18] sm:$0xff] %vm1090_vm0, %v1077_v40  ;;  %v1076_v43 = vadd.f32 %v1060_v37, %v821_v42 }
 0x2f3   : > { %v1529_v20 = vpop.f32.mrf.mxu0 }
 0x2f4   : > { %1093 = vst.msk [vmem:[%s2237_s24 + $0x10] sm:$0xff] %vm1090_vm0, %v1076_v43  ;;  %v1079_v24 = vadd.f32 %v1529_v20, %v1063_v39 }
 0x2f5   : > { %v831_v26 = vpop.f32.mrf.mxu0 }
 0x2f6   : > { %1096 = vst.msk [vmem:[%s2237_s24 + $0x28] sm:$0xff] %vm1090_vm0, %v1079_v24  ;;  %v1078_v29 = vadd.f32 %v1062_v22, %v831_v26 }
 0x2f7   : > { %v1532_v45 = vpop.f32.mrf.mxu0 }
 0x2f8   : > { %1095 = vst.msk [vmem:[%s2237_s24 + $0x20] sm:$0xff] %vm1090_vm0, %v1078_v29  ;;  %v1081_v47 = vadd.f32 %v1532_v45, %v1065_v23 }
 0x2f9   : > { %v841_v50 = vpop.f32.mrf.mxu0 }
 0x2fa   : > { %1098 = vst.msk [vmem:[%s2237_s24 + $0x38] sm:$0xff] %vm1090_vm0, %v1081_v47  ;;  %v1080_v52 = vadd.f32 %v1064_v44, %v841_v50 }
 0x2fb   : > { %v1535_v53 = vpop.f32.mrf.mxu0 }
 0x2fc   : > { %1097 = vst.msk [vmem:[%s2237_s24 + $0x30] sm:$0xff] %vm1090_vm0, %v1080_v52  ;;  %v1083_v57 = vadd.f32 %v1535_v53, %v1067_v46 }
 0x2fd   : > { %v851_v59 = vpop.f32.mrf.mxu0 }
 0x2fe   : > { %1100 = vst.msk [vmem:[%s2237_s24 + $0x48] sm:$0xff] %vm1090_vm0, %v1083_v57  ;;  %v1082_v61 = vadd.f32 %v1066_v55, %v851_v59 }
 0x2ff   : > { %v1538_v0 = vpop.f32.mrf.mxu0 }
 0x300   : > { %1099 = vst.msk [vmem:[%s2237_s24 + $0x40] sm:$0xff] %vm1090_vm0, %v1082_v61  ;;  %v1085_v2 = vadd.f32 %v1538_v0, %v1069_v56 }
 0x301   : > { %v861_v6 = vpop.f32.mrf.mxu0 }
 0x302   : > { %1102 = vst.msk [vmem:[%s2237_s24 + $0x58] sm:$0xff] %vm1090_vm0, %v1085_v2  ;;  %v1084_v8 = vadd.f32 %v1068_v63, %v861_v6 }
 0x303   : > { %v1541_v9 = vpop.f32.mrf.mxu0 }
 0x304   : > { %1101 = vst.msk [vmem:[%s2237_s24 + $0x50] sm:$0xff] %vm1090_vm0, %v1084_v8  ;;  %v1087_v13 = vadd.f32 %v1541_v9, %v1071_v1 }
 0x305   : > { %v871_v15 = vpop.f32.mrf.mxu0 }
 0x306   : > { %1104 = vst.msk [vmem:[%s2237_s24 + $0x68] sm:$0xff] %vm1090_vm0, %v1087_v13  ;;  %v1086_v62 = vadd.f32 %v1070_v10, %v871_v15 }
 0x307   : > { %v1544_v16 = vpop.f32.mrf.mxu0 }
 0x308   : > { %1103 = vst.msk [vmem:[%s2237_s24 + $0x60] sm:$0xff] %vm1090_vm0, %v1086_v62  ;;  %v1089_v4 = vadd.f32 %v1544_v16, %v1073_v12 }
 0x309   : > { %v881_v28 = vpop.f32.mrf.mxu0 }
 0x30a   : > { %1106 = vst.msk [vmem:[%s2237_s24 + $0x78] sm:$0xff] %vm1090_vm0, %v1089_v4  ;;  %v1088_v30 = vadd.f32 %v1072_v17, %v881_v28 }
 0x30c   : > { %1105 = vst.msk [vmem:[%s2237_s24 + $0x70] sm:$0xff] %vm1090_vm0, %v1088_v30 }
 0x30d PF: > { %p19_p5 = scmp.ge.s32.totalorder %s2051_s8, 4   ;;  %s2317_s21 = smov %s1889_s22 }
 0x30e   : > { %s2318_s22 = smov %s1893_s23  ;;  %s2319_s23 = smov %s2062_s26 }
 0x30f   : > { %s2320_s24 = smov %s2051_s8  ;;  %21 = sbr.rel (!%p19_p5) target bundleno = 6 (0x6), region = 104 }
 0x314   :  { %1129 = vsyncpa [#allocation3], 1 }
 0x315   :  { %1131 = vsyncpa [#allocation3 + $0x1], 1 }
 0x316   :  { %1132 = vsyncpa [#allocation5], 1 }
 0x317   :  { %1133 = vsyncpa [#allocation8], 1 }
 0x318   :  { %1134 = vsyncpa [#allocation11], 1 }

</bundles_post_ra>
